<compile_context>
chip_gen: v7x
topology: tpu7x:2x2x1
jax: 0.10.0
libtpu: 0.0.40
codegen_flags: <defaults>
</compile_context>

<pallas_src>
import functools

import jax
import jax.numpy as jnp
from jax.experimental import pallas as pl
from jax.experimental.pallas import tpu as pltpu


# -----------------------------------------------------------------------------
# Fused Pallas kernel: speed/XALL encoders + STE fuse + 2x graph conv + head.
# One grid step per batch; everything stays in one lane-dense (N, T*E) layout.
# -----------------------------------------------------------------------------
def _msstgin_fused_kernel(
    x_ref,       # (N, T*E)  speed values, broadcast over the E lanes
    xall_ref,    # (N, T*E)  XALL values, broadcast over the E lanes
    ste_ref,     # (N, T*E)  precomputed spatio-temporal embedding
    adj_ref,     # (N, N)    normalised adjacency
    mats_ref,    # (4, T*E, T*E) packed: [kron(I_T,fc_w2), kron(sp_wt^T,I_E),
                 #                         kron(I_T,g_w1), kron(I_T,g_w2)]
    rows_ref,    # (7, T*E)  packed rows (tiled over T): [sp_wf, sp_b, fc_w1,
                 #                         fc_b1, fc_b2, g_b1, g_b2]
    q_ref,       # (T*E, L)  fused prediction operator kron(p_wt^T, p_wp)
    pb_ref,      # (1, L)    prediction bias
    o_ref,       # (N, L)    de-normalised prediction
    *, mean, std,
):
    f32 = jnp.float32

    # Static slices of the packed weight refs are free.
    sp_wf, sp_b = rows_ref[0:1, :], rows_ref[1:2, :]
    fc_w1, fc_b1 = rows_ref[2:3, :], rows_ref[3:4, :]
    fc_b2 = rows_ref[4:5, :]
    g_b1, g_b2 = rows_ref[5:6, :], rows_ref[6:7, :]

    # ---- FC on XALL (features == 1 -> lane-dense VPU lift, then E-mix) -------
    # TODO(synk): CustomBatchNorm (bn=True) has no provided reference; identity.
    h = jnp.maximum(xall_ref[...] * fc_w1 + fc_b1, 0.0)
    xall_enc = jnp.dot(h, mats_ref[0], preferred_element_type=f32) + fc_b2

    # ---- SpeedTimeEnhanceEncoder: VPU lift + temporal mix (one MXU matmul) ----
    sp = jnp.maximum(x_ref[...] * sp_wf + sp_b, 0.0)
    sp_enc = jnp.dot(sp, mats_ref[1], preferred_element_type=f32)

    # ---- GSTMoudle: fuse + two graph-conv layers ------------------------------
    # Note: for the synthetic ring adjacency the A-step could be two
    # pltpu.roll adds; it is kept as a general (N,N) matmul so arbitrary
    # (CSV-loaded) graphs keep working.
    adj = adj_ref[...]
    hsum = sp_enc + xall_enc + ste_ref[...]
    g1 = jnp.dot(hsum, mats_ref[2], preferred_element_type=f32)
    g1 = jnp.maximum(jnp.dot(adj, g1, preferred_element_type=f32) + g_b1, 0.0)
    g2 = jnp.dot(g1, mats_ref[3], preferred_element_type=f32)
    g2 = jnp.maximum(jnp.dot(adj, g2, preferred_element_type=f32) + g_b2, 0.0)

    # ---- LSTMoudle head: fused (T->L)·(E->1) projection + de-normalisation ----
    y = jnp.dot(g2, q_ref[...], preferred_element_type=f32) + pb_ref[...]
    o_ref[...] = y * std + mean


# -----------------------------------------------------------------------------
# Parameter construction (deterministic, synthetic — no checkpoint / CSV IO)
# -----------------------------------------------------------------------------
def init_params(key, conf):
    E = conf["emb_size"]
    N = conf["site_num"]
    F = conf["features"]
    T = conf["input_length"]
    L = conf["output_length"]

    state = {"key": key}

    def w(shape, scale=0.1):
        state["key"], sub = jax.random.split(state["key"])   # lazy split
        return scale * jax.random.normal(sub, shape, dtype=jnp.float32)

    params = {
        # FC on XALL: features -> [E, E], activations [ReLU, None]
        "fc_w1": w((F, E)), "fc_b1": w((E,)),
        "fc_w2": w((E, E)), "fc_b2": w((E,)),
        # Embedding tables (day-of-week, minute-of-day, node position)
        "dow_emb": w((7, E)),
        "min_emb": w((288, E)),
        "pos_emb": w((N, E)),
        # SpeedTimeEnhanceEncoder
        "sp_wf": w((F, E)), "sp_b": w((E,)), "sp_wt": w((T, T)),
        # STEmbedding (spatial / temporal two-layer FCs)
        "se_w1": w((E, E)), "se_b1": w((E,)), "se_w2": w((E, E)), "se_b2": w((E,)),
        "te_w1": w((E, E)), "te_b1": w((E,)), "te_w2": w((E, E)), "te_b2": w((E,)),
        # GSTMoudle graph-conv layers
        "g_w1": w((E, E)), "g_b1": w((E,)),
        "g_w2": w((E, E)), "g_b2": w((E,)),
        # LSTMoudle prediction head
        "p_wt": w((L, T)), "p_wp": w((E, 1)), "p_b": w((1,)),
    }

    # TODO(synk): original module reads the adjacency from a CSV (pandas);
    # replaced with a deterministic synthetic ring graph + self loops, followed
    # by the module's min/max normalisation (guarded against a 0/0 for
    # degenerate all-equal graphs).
    adj = jnp.eye(N, dtype=jnp.float32)
    adj = adj + jnp.roll(jnp.eye(N, dtype=jnp.float32), 1, axis=1)
    adj = adj + jnp.roll(jnp.eye(N, dtype=jnp.float32), -1, axis=1)
    adj = jnp.clip(adj, 0.0, 1.0)
    rng = jnp.maximum(adj.max() - adj.min(), 1e-6)
    adj = (adj - adj.min()) / rng
    params["adj"] = adj
    return params


# -----------------------------------------------------------------------------
# Forward pass: one fused pallas_call.  Only embedding gathers, the tiny STE
# FCs, constant-operator packing and the final (B, L, N) permute stay in glue.
# -----------------------------------------------------------------------------
def msstgin_forward(params, conf, mean, std, X, DoW, D, H, M, XALL):
    # X, XALL: (B, T_in, N, F) float32;  DoW, M: (B, T_in) int32;  D, H unused.
    del D, H
    B, T, N, F = X.shape
    E = conf["emb_size"]
    L = conf["output_length"]
    TE = T * E
    assert F == 1, "kernel uses the VPU broadcast path for features == 1"
    assert N % 8 == 0 and TE % 128 == 0, "block shapes must satisfy (8,128) tiling"

    # ---- glue: embedding gathers + tiny STE FCs (would badly underfill MXU) --
    timestamp = params["dow_emb"][DoW] + params["min_emb"][M]            # (B,T,E)
    se = jnp.maximum(params["pos_emb"] @ params["se_w1"] + params["se_b1"], 0.0)
    se = se @ params["se_w2"] + params["se_b2"]                          # (N,E)
    te = jnp.maximum(timestamp @ params["te_w1"] + params["te_b1"], 0.0)
    te = te @ params["te_w2"] + params["te_b2"]                          # (B,T,E)
    ste = (se[None, :, None, :] + te[:, None, :, :]).reshape(B * N, TE)  # (b,n,t,e)

    # ---- glue: canonical (b, n, t, e) layout, values broadcast over E lanes --
    def bcast_over_e(v):                      # (B,T,N,1) -> (B*N, T*E)
        v = jnp.transpose(v[..., 0], (0, 2, 1)).reshape(B * N, T)
        return jnp.repeat(v, E, axis=1)
    x_bc = bcast_over_e(X)
    xall_bc = bcast_over_e(XALL)

    # ---- glue: pack small constant operators (static functions of weights) ---
    eye_t = jnp.eye(T, dtype=jnp.float32)
    eye_e = jnp.eye(E, dtype=jnp.float32)
    mats = jnp.stack([
        jnp.kron(eye_t, params["fc_w2"]),        # XALL-FC E-mix (block-diag)
        jnp.kron(params["sp_wt"].T, eye_e),      # temporal mix
        jnp.kron(eye_t, params["g_w1"]),         # graph-conv layer-1 E-mix
        jnp.kron(eye_t, params["g_w2"]),         # graph-conv layer-2 E-mix
    ])                                           # (4, TE, TE)

    def tile_t(v):                               # (E,)/(1,E) -> (1, T*E)
        return jnp.tile(jnp.reshape(v, (1, E)), (1, T))
    rows = jnp.concatenate([
        tile_t(params["sp_wf"]), tile_t(params["sp_b"]),
        tile_t(params["fc_w1"]), tile_t(params["fc_b1"]), tile_t(params["fc_b2"]),
        tile_t(params["g_b1"]), tile_t(params["g_b2"]),
    ], axis=0)                                   # (7, TE)

    q = jnp.kron(params["p_wt"].T, params["p_wp"])                 # (TE, L)
    pb = jnp.broadcast_to(jnp.reshape(params["p_b"], (1, 1)), (1, L))

    batch_spec = pl.BlockSpec((N, TE), lambda b: (b, 0))
    def const_spec(shape):
        return pl.BlockSpec(shape, lambda b: (0,) * len(shape))

    kernel = functools.partial(_msstgin_fused_kernel,
                               mean=float(mean), std=float(std))
    out = pl.pallas_call(
        kernel,
        out_shape=jax.ShapeDtypeStruct((B * N, L), jnp.float32),
        grid=(B,),
        in_specs=[
            batch_spec,                 # x (speed), broadcast over E
            batch_spec,                 # XALL, broadcast over E
            batch_spec,                 # STE
            const_spec((N, N)),         # adjacency
            const_spec((4, TE, TE)),    # packed (TE,TE) operators
            const_spec((7, TE)),        # packed row vectors / biases
            const_spec((TE, L)),        # fused prediction operator
            const_spec((1, L)),         # prediction bias
        ],
        out_specs=pl.BlockSpec((N, L), lambda b: (b, 0)),
        compiler_params=pltpu.CompilerParams(
            dimension_semantics=("parallel",)),   # v7x: one batch per TensorCore
    )(x_bc, xall_bc, ste, params["adj"], mats, rows, q, pb)

    # rows are (batch, node), cols are L_out  ->  (B, L_out, N)
    return out.reshape(B, N, L).transpose(0, 2, 1)


# -----------------------------------------------------------------------------
# Pure-JAX reference (same math, natural layouts) used as a correctness check.
# -----------------------------------------------------------------------------
def msstgin_reference(params, conf, mean, std, X, DoW, D, H, M, XALL):
    del D, H
    B, T, N, F = X.shape
    timestamp = params["dow_emb"][DoW] + params["min_emb"][M]            # (B,T,E)
    position = params["pos_emb"]                                         # (N,E)

    xall = jnp.maximum(XALL.reshape(-1, F) @ params["fc_w1"] + params["fc_b1"], 0.0)
    xall = (xall @ params["fc_w2"] + params["fc_b2"]).reshape(B, T, N, -1)

    sp = jnp.maximum(X @ params["sp_wf"] + params["sp_b"], 0.0)          # (B,T,N,E)
    sp = jnp.einsum("st,btne->bsne", params["sp_wt"], sp)

    se = jnp.maximum(position @ params["se_w1"] + params["se_b1"], 0.0)
    se = se @ params["se_w2"] + params["se_b2"]
    te = jnp.maximum(timestamp @ params["te_w1"] + params["te_b1"], 0.0)
    te = te @ params["te_w2"] + params["te_b2"]
    ste = se[None, None] + te[:, :, None, :]

    h = sp + xall + ste
    adj = params["adj"]
    h = jnp.maximum(jnp.einsum("mn,btne->btme", adj, h @ params["g_w1"])
                    + params["g_b1"], 0.0)
    h = jnp.maximum(jnp.einsum("mn,btne->btme", adj, h @ params["g_w2"])
                    + params["g_b2"], 0.0)

    tp = jnp.einsum("lt,btne->blne", params["p_wt"], h)                  # (B,L,N,E)
    y = tp @ params["p_wp"] + params["p_b"]                              # (B,L,N,1)
    return (y * std + mean)[..., 0]                                      # (B,L,N)


# -----------------------------------------------------------------------------
# Example run
# -----------------------------------------------------------------------------
if __name__ == "__main__":
    conf = {
        "emb_size": 32,
        "site_num": 16,
        "features": 1,
        "input_length": 8,
        "output_length": 4,
        "num_heads": 4,
        "file_adj": None,
    }
    mean, std = 50.0, 10.0
    B, T, N, F = 2, conf["input_length"], conf["site_num"], conf["features"]

    key = jax.random.PRNGKey(0)
    k_par, k_x, k_xall, k_dow, k_m = jax.random.split(key, 5)

    params = init_params(k_par, conf)

    X = jax.random.normal(k_x, (B, T, N, F), dtype=jnp.float32)
    XALL = jax.random.normal(k_xall, (B, T, N, F), dtype=jnp.float32)
    DoW = jax.random.randint(k_dow, (B, T), 0, 7, dtype=jnp.int32)
    M = jax.random.randint(k_m, (B, T), 0, 288, dtype=jnp.int32)
    D = jnp.zeros((B, T), dtype=jnp.int32)   # unused by forward
    H = jnp.zeros((B, T), dtype=jnp.int32)   # unused by forward

    fwd = jax.jit(functools.partial(msstgin_forward, params, conf, mean, std))
    out = fwd(X, DoW, D, H, M, XALL)
    jax.block_until_ready(out)

    assert out.shape == (B, conf["output_length"], N), out.shape
    assert out.dtype == jnp.float32

    ref = msstgin_reference(params, conf, mean, std, X, DoW, D, H, M, XALL)
    # Tolerance accounts for TPU default matmul precision (bf16 MXU passes)
    # taking different contraction orders in kernel vs. reference.
    max_err = float(jnp.max(jnp.abs(out - ref)))
    assert max_err < 5e-2, f"max abs error vs reference: {max_err}"

    print("KERNEL_OK")
</pallas_src>

<mosaic_0001>
module attributes {stable_mosaic.version = 11 : i64} {
  func.func @_msstgin_fused_kernel(%arg0: i32, %arg1: memref<16x256xf32, #tpu.memory_space<vmem>>, %arg2: memref<16x256xf32, #tpu.memory_space<vmem>>, %arg3: memref<16x256xf32, #tpu.memory_space<vmem>>, %arg4: memref<16x16xf32, #tpu.memory_space<vmem>>, %arg5: memref<4x256x256xf32, #tpu.memory_space<vmem>>, %arg6: memref<7x256xf32, #tpu.memory_space<vmem>>, %arg7: memref<256x4xf32, #tpu.memory_space<vmem>>, %arg8: memref<1x4xf32, #tpu.memory_space<vmem>>, %arg9: memref<16x4xf32, #tpu.memory_space<vmem>>) attributes {dimension_semantics = [#tpu.dimension_semantics<parallel>], iteration_bounds = array<i64: 2>, scalar_prefetch = 0 : i64, scratch_operands = 0 : i64, tpu.core_type = #tpu.core_type<tc>, window_params = [{transform_indices = @transform_0, window_bounds = array<i64: 16, 256>}, {transform_indices = @transform_1, window_bounds = array<i64: 16, 256>}, {transform_indices = @transform_2, window_bounds = array<i64: 16, 256>}, {pipeline_mode = #tpu.pipeline_mode<synchronous>, transform_indices = @transform_3, window_bounds = array<i64: 16, 16>}, {pipeline_mode = #tpu.pipeline_mode<synchronous>, transform_indices = @transform_4, window_bounds = array<i64: 4, 256, 256>}, {pipeline_mode = #tpu.pipeline_mode<synchronous>, transform_indices = @transform_5, window_bounds = array<i64: 7, 256>}, {pipeline_mode = #tpu.pipeline_mode<synchronous>, transform_indices = @transform_6, window_bounds = array<i64: 256, 4>}, {pipeline_mode = #tpu.pipeline_mode<synchronous>, transform_indices = @transform_7, window_bounds = array<i64: 1, 4>}, {transform_indices = @transform_8, window_bounds = array<i64: 16, 4>}]} {
    %c0 = arith.constant 0 : index
    %c0_0 = arith.constant 0 : index
    %0 = vector.load %arg6[%c0, %c0_0] : memref<7x256xf32, #tpu.memory_space<vmem>>, vector<1x256xf32>
    %c1 = arith.constant 1 : index
    %c0_1 = arith.constant 0 : index
    %1 = vector.load %arg6[%c1, %c0_1] : memref<7x256xf32, #tpu.memory_space<vmem>>, vector<1x256xf32>
    %c2 = arith.constant 2 : index
    %c0_2 = arith.constant 0 : index
    %2 = vector.load %arg6[%c2, %c0_2] : memref<7x256xf32, #tpu.memory_space<vmem>>, vector<1x256xf32>
    %c3 = arith.constant 3 : index
    %c0_3 = arith.constant 0 : index
    %3 = vector.load %arg6[%c3, %c0_3] : memref<7x256xf32, #tpu.memory_space<vmem>>, vector<1x256xf32>
    %c4 = arith.constant 4 : index
    %c0_4 = arith.constant 0 : index
    %4 = vector.load %arg6[%c4, %c0_4] : memref<7x256xf32, #tpu.memory_space<vmem>>, vector<1x256xf32>
    %c5 = arith.constant 5 : index
    %c0_5 = arith.constant 0 : index
    %5 = vector.load %arg6[%c5, %c0_5] : memref<7x256xf32, #tpu.memory_space<vmem>>, vector<1x256xf32>
    %c6 = arith.constant 6 : index
    %c0_6 = arith.constant 0 : index
    %6 = vector.load %arg6[%c6, %c0_6] : memref<7x256xf32, #tpu.memory_space<vmem>>, vector<1x256xf32>
    %c0_7 = arith.constant 0 : index
    %c0_8 = arith.constant 0 : index
    %7 = vector.load %arg2[%c0_7, %c0_8] : memref<16x256xf32, #tpu.memory_space<vmem>>, vector<16x256xf32>
    %8 = vector.broadcast %2 : vector<1x256xf32> to vector<16x256xf32>
    %9 = arith.mulf %7, %8 : vector<16x256xf32>
    %10 = vector.broadcast %3 : vector<1x256xf32> to vector<16x256xf32>
    %11 = arith.addf %9, %10 : vector<16x256xf32>
    %cst = arith.constant 0.000000e+00 : f32
    %12 = vector.broadcast %cst : f32 to vector<16x256xf32>
    %13 = arith.maximumf %11, %12 : vector<16x256xf32>
    %c0_9 = arith.constant 0 : index
    %c0_10 = arith.constant 0 : index
    %c0_11 = arith.constant 0 : index
    %14 = vector.load %arg5[%c0_9, %c0_10, %c0_11] : memref<4x256x256xf32, #tpu.memory_space<vmem>>, vector<1x256x256xf32>
    %15 = vector.shape_cast %14 : vector<1x256x256xf32> to vector<256x256xf32>
    %cst_12 = arith.constant dense<0.000000e+00> : vector<16x256xf32>
    %16 = tpu.matmul %13, %15, %cst_12 {dimension_numbers = #tpu.dot_dimension_numbers<[1], [0], [0], [1], [0, 0, 1, 1], [], []>} : vector<16x256xf32>, vector<256x256xf32>, vector<16x256xf32> -> vector<16x256xf32>
    %17 = vector.broadcast %4 : vector<1x256xf32> to vector<16x256xf32>
    %18 = arith.addf %16, %17 : vector<16x256xf32>
    %c0_13 = arith.constant 0 : index
    %c0_14 = arith.constant 0 : index
    %19 = vector.load %arg1[%c0_13, %c0_14] : memref<16x256xf32, #tpu.memory_space<vmem>>, vector<16x256xf32>
    %20 = vector.broadcast %0 : vector<1x256xf32> to vector<16x256xf32>
    %21 = arith.mulf %19, %20 : vector<16x256xf32>
    %22 = vector.broadcast %1 : vector<1x256xf32> to vector<16x256xf32>
    %23 = arith.addf %21, %22 : vector<16x256xf32>
    %cst_15 = arith.constant 0.000000e+00 : f32
    %24 = vector.broadcast %cst_15 : f32 to vector<16x256xf32>
    %25 = arith.maximumf %23, %24 : vector<16x256xf32>
    %c1_16 = arith.constant 1 : index
    %c0_17 = arith.constant 0 : index
    %c0_18 = arith.constant 0 : index
    %26 = vector.load %arg5[%c1_16, %c0_17, %c0_18] : memref<4x256x256xf32, #tpu.memory_space<vmem>>, vector<1x256x256xf32>
    %27 = vector.shape_cast %26 : vector<1x256x256xf32> to vector<256x256xf32>
    %cst_19 = arith.constant dense<0.000000e+00> : vector<16x256xf32>
    %28 = tpu.matmul %25, %27, %cst_19 {dimension_numbers = #tpu.dot_dimension_numbers<[1], [0], [0], [1], [0, 0, 1, 1], [], []>} : vector<16x256xf32>, vector<256x256xf32>, vector<16x256xf32> -> vector<16x256xf32>
    %c0_20 = arith.constant 0 : index
    %c0_21 = arith.constant 0 : index
    %29 = vector.load %arg4[%c0_20, %c0_21] : memref<16x16xf32, #tpu.memory_space<vmem>>, vector<16x16xf32>
    %30 = arith.addf %28, %18 : vector<16x256xf32>
    %c0_22 = arith.constant 0 : index
    %c0_23 = arith.constant 0 : index
    %31 = vector.load %arg3[%c0_22, %c0_23] : memref<16x256xf32, #tpu.memory_space<vmem>>, vector<16x256xf32>
    %32 = arith.addf %30, %31 : vector<16x256xf32>
    %c2_24 = arith.constant 2 : index
    %c0_25 = arith.constant 0 : index
    %c0_26 = arith.constant 0 : index
    %33 = vector.load %arg5[%c2_24, %c0_25, %c0_26] : memref<4x256x256xf32, #tpu.memory_space<vmem>>, vector<1x256x256xf32>
    %34 = vector.shape_cast %33 : vector<1x256x256xf32> to vector<256x256xf32>
    %cst_27 = arith.constant dense<0.000000e+00> : vector<16x256xf32>
    %35 = tpu.matmul %32, %34, %cst_27 {dimension_numbers = #tpu.dot_dimension_numbers<[1], [0], [0], [1], [0, 0, 1, 1], [], []>} : vector<16x256xf32>, vector<256x256xf32>, vector<16x256xf32> -> vector<16x256xf32>
    %cst_28 = arith.constant dense<0.000000e+00> : vector<16x256xf32>
    %36 = tpu.matmul %29, %35, %cst_28 {dimension_numbers = #tpu.dot_dimension_numbers<[1], [0], [0], [1], [0, 0, 1, 1], [], []>} : vector<16x16xf32>, vector<16x256xf32>, vector<16x256xf32> -> vector<16x256xf32>
    %37 = vector.broadcast %5 : vector<1x256xf32> to vector<16x256xf32>
    %38 = arith.addf %36, %37 : vector<16x256xf32>
    %cst_29 = arith.constant 0.000000e+00 : f32
    %39 = vector.broadcast %cst_29 : f32 to vector<16x256xf32>
    %40 = arith.maximumf %38, %39 : vector<16x256xf32>
    %c3_30 = arith.constant 3 : index
    %c0_31 = arith.constant 0 : index
    %c0_32 = arith.constant 0 : index
    %41 = vector.load %arg5[%c3_30, %c0_31, %c0_32] : memref<4x256x256xf32, #tpu.memory_space<vmem>>, vector<1x256x256xf32>
    %42 = vector.shape_cast %41 : vector<1x256x256xf32> to vector<256x256xf32>
    %cst_33 = arith.constant dense<0.000000e+00> : vector<16x256xf32>
    %43 = tpu.matmul %40, %42, %cst_33 {dimension_numbers = #tpu.dot_dimension_numbers<[1], [0], [0], [1], [0, 0, 1, 1], [], []>} : vector<16x256xf32>, vector<256x256xf32>, vector<16x256xf32> -> vector<16x256xf32>
    %cst_34 = arith.constant dense<0.000000e+00> : vector<16x256xf32>
    %44 = tpu.matmul %29, %43, %cst_34 {dimension_numbers = #tpu.dot_dimension_numbers<[1], [0], [0], [1], [0, 0, 1, 1], [], []>} : vector<16x16xf32>, vector<16x256xf32>, vector<16x256xf32> -> vector<16x256xf32>
    %45 = vector.broadcast %6 : vector<1x256xf32> to vector<16x256xf32>
    %46 = arith.addf %44, %45 : vector<16x256xf32>
    %cst_35 = arith.constant 0.000000e+00 : f32
    %47 = vector.broadcast %cst_35 : f32 to vector<16x256xf32>
    %48 = arith.maximumf %46, %47 : vector<16x256xf32>
    %c0_36 = arith.constant 0 : index
    %c0_37 = arith.constant 0 : index
    %49 = vector.load %arg7[%c0_36, %c0_37] : memref<256x4xf32, #tpu.memory_space<vmem>>, vector<256x4xf32>
    %cst_38 = arith.constant dense<0.000000e+00> : vector<16x4xf32>
    %50 = tpu.matmul %48, %49, %cst_38 {dimension_numbers = #tpu.dot_dimension_numbers<[1], [0], [0], [1], [0, 0, 1, 1], [], []>} : vector<16x256xf32>, vector<256x4xf32>, vector<16x4xf32> -> vector<16x4xf32>
    %c0_39 = arith.constant 0 : index
    %c0_40 = arith.constant 0 : index
    %51 = vector.load %arg8[%c0_39, %c0_40] : memref<1x4xf32, #tpu.memory_space<vmem>>, vector<1x4xf32>
    %52 = vector.broadcast %51 : vector<1x4xf32> to vector<16x4xf32>
    %53 = arith.addf %50, %52 : vector<16x4xf32>
    %cst_41 = arith.constant 1.000000e+01 : f32
    %54 = vector.broadcast %cst_41 : f32 to vector<16x4xf32>
    %55 = arith.mulf %53, %54 : vector<16x4xf32>
    %cst_42 = arith.constant 5.000000e+01 : f32
    %56 = vector.broadcast %cst_42 : f32 to vector<16x4xf32>
    %57 = arith.addf %55, %56 : vector<16x4xf32>
    %c0_43 = arith.constant 0 : index
    %c0_44 = arith.constant 0 : index
    %58 = vector.load %arg9[%c0_43, %c0_44] : memref<16x4xf32, #tpu.memory_space<vmem>>, vector<16x4xf32>
    tpu.vector_store %arg9[%c0_43, %c0_44], %57 {strides = array<i32>} : memref<16x4xf32, #tpu.memory_space<vmem>>, vector<16x4xf32>,
    return
  }
  func.func @transform_0(%arg0: i32) -> (i32, i32) {
    %c0_i32 = arith.constant 0 : i32
    %c0_i32_0 = arith.constant 0 : i32
    return %arg0, %c0_i32 : i32, i32
  }
  func.func @transform_1(%arg0: i32) -> (i32, i32) {
    %c0_i32 = arith.constant 0 : i32
    %c0_i32_0 = arith.constant 0 : i32
    return %arg0, %c0_i32 : i32, i32
  }
  func.func @transform_2(%arg0: i32) -> (i32, i32) {
    %c0_i32 = arith.constant 0 : i32
    %c0_i32_0 = arith.constant 0 : i32
    return %arg0, %c0_i32 : i32, i32
  }
  func.func @transform_3(%arg0: i32) -> (i32, i32) {
    %c0_i32 = arith.constant 0 : i32
    %c0_i32_0 = arith.constant 0 : i32
    %c0_i32_1 = arith.constant 0 : i32
    return %c0_i32, %c0_i32_0 : i32, i32
  }
  func.func @transform_4(%arg0: i32) -> (i32, i32, i32) {
    %c0_i32 = arith.constant 0 : i32
    %c0_i32_0 = arith.constant 0 : i32
    %c0_i32_1 = arith.constant 0 : i32
    %c0_i32_2 = arith.constant 0 : i32
    return %c0_i32, %c0_i32_0, %c0_i32_1 : i32, i32, i32
  }
  func.func @transform_5(%arg0: i32) -> (i32, i32) {
    %c0_i32 = arith.constant 0 : i32
    %c0_i32_0 = arith.constant 0 : i32
    %c0_i32_1 = arith.constant 0 : i32
    return %c0_i32, %c0_i32_0 : i32, i32
  }
  func.func @transform_6(%arg0: i32) -> (i32, i32) {
    %c0_i32 = arith.constant 0 : i32
    %c0_i32_0 = arith.constant 0 : i32
    %c0_i32_1 = arith.constant 0 : i32
    return %c0_i32, %c0_i32_0 : i32, i32
  }
  func.func @transform_7(%arg0: i32) -> (i32, i32) {
    %c0_i32 = arith.constant 0 : i32
    %c0_i32_0 = arith.constant 0 : i32
    %c0_i32_1 = arith.constant 0 : i32
    return %c0_i32, %c0_i32_0 : i32, i32
  }
  func.func @transform_8(%arg0: i32) -> (i32, i32) {
    %c0_i32 = arith.constant 0 : i32
    %c0_i32_0 = arith.constant 0 : i32
    return %arg0, %c0_i32 : i32, i32
  }
}

</mosaic_0001>

<bundles_post_ra>
// kernel: msstgin_forward.1
= control target key start
LH: loop header
LB: loop body
LE: loop exit
PB: predicated region body
PF: predicated region fallthrough
CT: control target
= control target key end

     0   :  { %s2060_s27 = smov 0   ;;  %s3068_s0 = inlined_call_operand.vmem [shape: f32[32,256], index: 0, kind: input, shape index: {}]   ;;  %s3069_s1 = inlined_call_operand.vmem [shape: f32[32,256], index: 1, kind: input, shape index: {}]   ;;  %s3070_s2 = inlined_call_operand.vmem [shape: f32[32,256], index: 2, kind: input, shape index: {}]   ;;  %s3071_s3 = inlined_call_operand.vmem [shape: f32[16,16], index: 3, kind: input, shape index: {}]   ;;  %s3072_s4 = inlined_call_operand.vmem [shape: f32[4,256,256], index: 4, kind: input, shape index: {}]   ;;  %s3073_s5 = inlined_call_operand.vmem [shape: f32[7,256], index: 5, kind: input, shape index: {}]   ;;  %s3074_s6 = inlined_call_operand.vmem [shape: f32[256,4], index: 6, kind: input, shape index: {}]   ;;  %s3075_s7 = inlined_call_operand.vmem [shape: f32[1,4], index: 7, kind: input, shape index: {}]   ;;  %s3076_s8 = inlined_call_operand.vmem [shape: f32[32,4], index: 8, kind: output, shape index: {}]  }
   0x1 LB: > { %s1431_s28 = sadd.s32 4294967295, %s2012_s27   ;;  %p1435_p0 = scmp.ge.s32.totalorder %s2012_s27, 1  ;;  %s2012_s27 = sphi %s2060_s27, %s18_s27  }
   0x2   : > { %p288_p1 = scmp.lt.s32.totalorder %s2012_s27, 3 }
   0x4   : > { %p289_p2 = pnand %p1435_p0, %p288_p1 }
   0x5   : > { %v414_v0 = vld [vmem:[%s3072_s4 + $0x8] sm:$0xff] (!%p289_p2)  ;;  %v416_v1 = vld [vmem:[%s3072_s4 + $0x18] sm:$0xff] (!%p289_p2)  ;;  %v413_v2 = vld [vmem:[%s3072_s4] sm:$0xff] (!%p289_p2)  ;;  %s1436_s29 = sshll.u32 (!%p289_p2), %s1431_s28, 1  ;;  %v380_v25 = vlaneseq (!%p289_p2)  ;;  %vm908_vm0 = vcmask (!%p289_p2), 130048   ;;  %vm1348_vm1 = vcmask (!%p289_p2), 31744  }
   0x6   : > { %292 = sbr.rel (%p289_p2) target bundleno = 1462 (0x5b6), region = 52  ;;  %v1693_v3 = vpack.c.bf16 (!%p289_p2), %v416_v1, %v414_v0  ;;  %v415_v4 = vld [vmem:[%s3072_s4 + $0x10] sm:$0xff] (!%p289_p2)  ;;  %v418_v5 = vld [vmem:[%s3072_s4 + $0x28] sm:$0xff] (!%p289_p2)  ;;  %v420_v6 = vld [vmem:[%s3072_s4 + $0x38] sm:$0xff] (!%p289_p2)  ;;  %p336_p3 = scmp.lt.s32.totalorder (!%p289_p2), %s1436_s29, 3 }
   0x7   : > { %v1695_v7 = vpack.c.bf16 (!%p289_p2), %v415_v4, %v413_v2  ;;  %v1697_v8 = vpack.c.bf16 (!%p289_p2), %v420_v6, %v418_v5  ;;  %v417_v9 = vld [vmem:[%s3072_s4 + $0x20] sm:$0xff] (!%p289_p2)  ;;  %v419_v10 = vld [vmem:[%s3072_s4 + $0x30] sm:$0xff] (!%p289_p2)  ;;  %v422_v11 = vld [vmem:[%s3072_s4 + $0x48] sm:$0xff] (!%p289_p2)  ;;  %v2136_v32 = vshrl.u32 (!%p289_p2), %v380_v25, 7 }
   0x8   : > { %1694 = vmatprep.subr.bf16.mxu0 (!%p289_p2), %v1693_v3  ;;  %v424_v12 = vld [vmem:[%s3072_s4 + $0x58] sm:$0xff] (!%p289_p2)  ;;  %v1699_v13 = vpack.c.bf16 (!%p289_p2), %v419_v10, %v417_v9  ;;  %v421_v15 = vld [vmem:[%s3072_s4 + $0x40] sm:$0xff] (!%p289_p2)  ;;  %v423_v16 = vld [vmem:[%s3072_s4 + $0x50] sm:$0xff] (!%p289_p2) }
   0x9   : > { %1696 = vmatpush1.bf16.msra.mxu0 (!%p289_p2), %v1695_v7  ;;  %v1701_v14 = vpack.c.bf16 (!%p289_p2), %v424_v12, %v422_v11  ;;  %v426_v17 = vld [vmem:[%s3072_s4 + $0x68] sm:$0xff] (!%p289_p2)  ;;  %v428_v18 = vld [vmem:[%s3072_s4 + $0x78] sm:$0xff] (!%p289_p2)  ;;  %v1703_v19 = vpack.c.bf16 (!%p289_p2), %v423_v16, %v421_v15  ;;  %v425_v21 = vld [vmem:[%s3072_s4 + $0x60] sm:$0xff] (!%p289_p2)  ;;  %v2160_v39 = vsub.s32 (!%p289_p2), 1, %v2136_v32 }
   0xa   : > { %1698 = vmatprep.subr.bf16.mxu0 (!%p289_p2), %v1697_v8  ;;  %v1705_v20 = vpack.c.bf16 (!%p289_p2), %v428_v18, %v426_v17  ;;  %v427_v22 = vld [vmem:[%s3072_s4 + $0x70] sm:$0xff] (!%p289_p2)  ;;  %v430_v23 = vld [vmem:[%s3072_s4 + $0x88] sm:$0xff] (!%p289_p2)  ;;  %v432_v24 = vld [vmem:[%s3072_s4 + $0x98] sm:$0xff] (!%p289_p2) }
   0xb   : > { %v1707_v26 = vpack.c.bf16 (!%p289_p2), %v427_v22, %v425_v21  ;;  %v1709_v27 = vpack.c.bf16 (!%p289_p2), %v432_v24, %v430_v23  ;;  %v429_v28 = vld [vmem:[%s3072_s4 + $0x80] sm:$0xff] (!%p289_p2)  ;;  %v431_v29 = vld [vmem:[%s3072_s4 + $0x90] sm:$0xff] (!%p289_p2)  ;;  %v434_v30 = vld [vmem:[%s3072_s4 + $0xa8] sm:$0xff] (!%p289_p2) }
   0xc   : > { %v436_v31 = vld [vmem:[%s3072_s4 + $0xb8] sm:$0xff] (!%p289_p2)  ;;  %v1711_v33 = vpack.c.bf16 (!%p289_p2), %v431_v29, %v429_v28  ;;  %v433_v35 = vld [vmem:[%s3072_s4 + $0xa0] sm:$0xff] (!%p289_p2)  ;;  %v435_v36 = vld [vmem:[%s3072_s4 + $0xb0] sm:$0xff] (!%p289_p2)  ;;  %v2277_v29 = vsub.s32 (!%p289_p2), 0, %v2136_v32 }
   0xd   : > { %1700 = vmatpush1.bf16.msra.mxu0 %v1699_v13  ;;  %s3078_s29 = smov (!%p336_p3, %s1436_s29), 3  ;;  %v1713_v34 = vpack.c.bf16 %v436_v31, %v434_v30  ;;  %v438_v37 = vld [vmem:[%s3072_s4 + $0xc8] sm:$0xff]  ;;  %v440_v38 = vld [vmem:[%s3072_s4 + $0xd8] sm:$0xff]  ;;  %v1715_v40 = vpack.c.bf16 %v435_v36, %v433_v35  ;;  %v437_v41 = vld [vmem:[%s3072_s4 + $0xc0] sm:$0xff] }
   0xe   : > { %1702 = vmatprep.subr.bf16.mxu0 %v1701_v14  ;;  %s2139_s12 = sshll.u32 %s3078_s29, 4  ;;  %v1717_v42 = vpack.c.bf16 %v440_v38, %v438_v37  ;;  %v439_v43 = vld [vmem:[%s3072_s4 + $0xd0] sm:$0xff]  ;;  %v2171_v44 = vld [vmem:[%s3073_s5 + $0x2] ss:$8 sm:$0x3]  ;;  %v444_v47 = vld [vmem:[%s3072_s4 + $0xf8] sm:$0xff] }
   0xf   : > { %s2157_s22 = scalar_lea.vmem %s3069_s1, %s2139_s12  ;;  %v442_v46 = vld [vmem:[%s3072_s4 + $0xe8] sm:$0xff]  ;;  %v2187_v49 = vrot.slane %v2171_v44, %v2160_v39  ;;  %v1719_v51 = vpack.c.bf16 %v439_v43, %v437_v41  ;;  %v441_v54 = vld [vmem:[%s3072_s4 + $0xe0] sm:$0xff]  ;;  %v443_v55 = vld [vmem:[%s3072_s4 + $0xf0] sm:$0xff]  ;;  %s2349_s23 = scalar_lea.vmem %s3068_s0, %s2139_s12 }
  0x10   : > { %v376_v45 = vld [vmem:[%s2157_s22 + $0x8] sm:$0xff]  ;;  %v1721_v53 = vpack.c.bf16 %v444_v47, %v442_v46  ;;  %v448_v57 = vld [vmem:[%s3072_s4 + $0x118] sm:$0xff]  ;;  %v1723_v59 = vpack.c.bf16 %v443_v55, %v441_v54  ;;  %v445_v62 = vld [vmem:[%s3072_s4 + $0x100] sm:$0xff]  ;;  %s354_s30 = scalar_lea.vmem %s3070_s2, %s2139_s12  ;;  %s1446_s10 = sshll.u32 %s3078_s29, 3 }
  0x11   : > { %1704 = vmatpush1.bf16.msra.mxu0 %v1703_v19  ;;  %v2183_v48 = vld [vmem:[%s3073_s5 + $0x3] ss:$8 sm:$0x3]  ;;  %v391_v52 = vmul.f32 %v2187_v49, %v376_v45  ;;  %v447_v63 = vld [vmem:[%s3072_s4 + $0x110] sm:$0xff]  ;;  %v452_v1 = vld [vmem:[%s3072_s4 + $0x138] sm:$0xff]  ;;  %s360_s13 = scalar_lea.vmem %s3076_s8, %s1446_s10 }
  0x12   : > { %1706 = vmatprep.subr.bf16.mxu0 %v1705_v20  ;;  %v2191_v50 = vrot.slane %v2183_v48, %v2160_v39  ;;  %v446_v56 = vld [vmem:[%s3072_s4 + $0x108] sm:$0xff]  ;;  %v1727_v2 = vpack.c.bf16 %v447_v63, %v445_v62  ;;  %v449_v4 = vld [vmem:[%s3072_s4 + $0x120] sm:$0xff]  ;;  %v451_v5 = vld [vmem:[%s3072_s4 + $0x130] sm:$0xff] }
  0x13   : > { %v1725_v61 = vpack.c.bf16 %v448_v57, %v446_v56  ;;  %v450_v0 = vld [vmem:[%s3072_s4 + $0x128] sm:$0xff]  ;;  %v456_v7 = vld [vmem:[%s3072_s4 + $0x158] sm:$0xff]  ;;  %v1731_v8 = vpack.c.bf16 %v451_v5, %v449_v4  ;;  %v453_v10 = vld [vmem:[%s3072_s4 + $0x140] sm:$0xff]  ;;  %v398_v4 = vrot.slane %v2183_v48, %v2277_v29 }
  0x14   : > { %v406_v58 = vadd.f32 %v2191_v50, %v391_v52  ;;  %v1729_v3 = vpack.c.bf16 %v452_v1, %v450_v0  ;;  %v454_v6 = vld [vmem:[%s3072_s4 + $0x148] sm:$0xff]  ;;  %v455_v11 = vld [vmem:[%s3072_s4 + $0x150] sm:$0xff]  ;;  %v460_v13 = vld [vmem:[%s3072_s4 + $0x178] sm:$0xff] }
  0x15   : > { %1708 = vmatpush1.bf16.msra.mxu0 %v1707_v26  ;;  %v1733_v9 = vpack.c.bf16 %v456_v7, %v454_v6  ;;  %v458_v12 = vld [vmem:[%s3072_s4 + $0x168] sm:$0xff]  ;;  %v1735_v14 = vpack.c.bf16 %v455_v11, %v453_v10  ;;  %v457_v16 = vld [vmem:[%s3072_s4 + $0x160] sm:$0xff]  ;;  %v459_v17 = vld [vmem:[%s3072_s4 + $0x170] sm:$0xff] }
  0x16   : > { %1710 = vmatprep.subr.bf16.mxu0 %v1709_v27  ;;  %v410_v60 = vmax.f32 %v406_v58, 0.0  ;;  %v1737_v15 = vpack.c.bf16 %v460_v13, %v458_v12  ;;  %v462_v18 = vld [vmem:[%s3072_s4 + $0x188] sm:$0xff]  ;;  %v464_v19 = vld [vmem:[%s3072_s4 + $0x198] sm:$0xff]  ;;  %v1739_v20 = vpack.c.bf16 %v459_v17, %v457_v16  ;;  %v461_v22 = vld [vmem:[%s3072_s4 + $0x180] sm:$0xff] }
  0x17   : > { %v1741_v21 = vpack.c.bf16 %v464_v19, %v462_v18  ;;  %v463_v23 = vld [vmem:[%s3072_s4 + $0x190] sm:$0xff]  ;;  %v466_v24 = vld [vmem:[%s3072_s4 + $0x1a8] sm:$0xff]  ;;  %v468_v25 = vld [vmem:[%s3072_s4 + $0x1b8] sm:$0xff] }
  0x18   : > { %552 = vmatprep.mubr.f32.mxu0 %v410_v60  ;;  %v1518_v26 = vld [vmem:[%s3072_s4 + $0x408] sm:$0xff]  ;;  %v465_v27 = vld [vmem:[%s3072_s4 + $0x1a0] sm:$0xff]  ;;  %v467_v28 = vld [vmem:[%s3072_s4 + $0x1b0] sm:$0xff] }
  0x19   : > { %1712 = vmatpush1.bf16.msra.mxu0 %v1711_v33  ;;  %v1520_v30 = vld [vmem:[%s3072_s4 + $0x418] sm:$0xff]  ;;  %v1517_v31 = vld [vmem:[%s3072_s4 + $0x400] sm:$0xff]  ;;  %v1519_v33 = vld [vmem:[%s3072_s4 + $0x410] sm:$0xff]  ;;  %v1747_v56 = vpack.c.bf16 %v467_v28, %v465_v27 }
  0x1a   : > { %1714 = vmatprep.subr.bf16.mxu0 %v1713_v34  ;;  %v1743_v34 = vpack.c.bf16 %v463_v23, %v461_v22  ;;  %v1821_v35 = vpack.c.bf16 %v1520_v30, %v1518_v26  ;;  %v1823_v36 = vpack.c.bf16 %v1519_v33, %v1517_v31  ;;  %v1522_v32 = vld [vmem:[%s3072_s4 + $0x428] sm:$0xff]  ;;  %v1524_v37 = vld [vmem:[%s3072_s4 + $0x438] sm:$0xff]  ;;  %v1521_v38 = vld [vmem:[%s3072_s4 + $0x420] sm:$0xff] }
  0x1b   : > { %v1825_v41 = vpack.c.bf16 %v1524_v37, %v1522_v32  ;;  %v1526_v43 = vld [vmem:[%s3072_s4 + $0x448] sm:$0xff]  ;;  %v1528_v45 = vld [vmem:[%s3072_s4 + $0x458] sm:$0xff]  ;;  %v471_v52 = vld [vmem:[%s3072_s4 + $0x1d0] sm:$0xff] }
  0x1c   : > { %v470_v46 = vld [vmem:[%s3072_s4 + $0x1c8] sm:$0xff]  ;;  %v472_v47 = vld [vmem:[%s3072_s4 + $0x1d8] sm:$0xff]  ;;  %1822 = vmatprep.subr.bf16.mxu1 %v1821_v35  ;;  %v375_v54 = vld [vmem:[%s2157_s22] sm:$0xff]  ;;  %v1829_v58 = vpack.c.bf16 %v1528_v45, %v1526_v43 }
  0x1d   : > { %1716 = vmatpush1.bf16.msra.mxu0 %v1715_v40  ;;  %v1745_v40 = vpack.c.bf16 %v468_v25, %v466_v24  ;;  %1824 = vmatpush1.bf16.msra.mxu1 %v1823_v36  ;;  %v378_v57 = vld [vmem:[%s2157_s22 + $0x18] sm:$0xff]  ;;  %v1527_v60 = vld [vmem:[%s3072_s4 + $0x450] sm:$0xff]  ;;  %v1530_v62 = vld [vmem:[%s3072_s4 + $0x468] sm:$0xff] }
  0x1e   : > { %1718 = vmatprep.subr.bf16.mxu0 %v1717_v42  ;;  %v1523_v42 = vld [vmem:[%s3072_s4 + $0x430] sm:$0xff]  ;;  %1826 = vmatprep.subr.bf16.mxu1 %v1825_v41  ;;  %v1532_v63 = vld [vmem:[%s3072_s4 + $0x478] sm:$0xff]  ;;  %v474_v0 = vld [vmem:[%s3072_s4 + $0x1e8] sm:$0xff]  ;;  %v393_v6 = vmul.f32 %v2187_v49, %v378_v57 }
  0x1f   : > { %v1827_v55 = vpack.c.bf16 %v1523_v42, %v1521_v38  ;;  %v476_v1 = vld [vmem:[%s3072_s4 + $0x1f8] sm:$0xff]  ;;  %v377_v7 = vld [vmem:[%s2157_s22 + $0x10] sm:$0xff]  ;;  %v2364_v10 = vld [vmem:[%s3073_s5 + $0x1] ss:$8 sm:$0x3]  ;;  %v1833_v48 = vpack.c.bf16 %v1532_v63, %v1530_v62 }
  0x20   : > { %v1529_v49 = vld [vmem:[%s3072_s4 + $0x460] sm:$0xff]  ;;  %v1531_v12 = vld [vmem:[%s3072_s4 + $0x470] sm:$0xff]  ;;  %v1753_v13 = vpack.c.bf16 %v476_v1, %v474_v0  ;;  %v1536_v16 = vld [vmem:[%s3072_s4 + $0x498] sm:$0xff]  ;;  %v2393_v25 = vrot.slane %v2364_v10, %v2160_v39 }
  0x21   : > { %1720 = vmatpush1.bf16.msra.mxu0 %v1719_v51  ;;  %v469_v51 = vld [vmem:[%s3072_s4 + $0x1c0] sm:$0xff]  ;;  %1828 = vmatpush1.bf16.msra.mxu1 %v1827_v55  ;;  %v1454_v18 = vld [vmem:[%s3072_s4 + $0x208] sm:$0xff]  ;;  %v1456_v19 = vld [vmem:[%s3072_s4 + $0x218] sm:$0xff]  ;;  %v1835_v23 = vpack.c.bf16 %v1531_v12, %v1529_v49 }
  0x22   : > { %1722 = vmatprep.subr.bf16.mxu0 %v1721_v53  ;;  %v383_v53 = vrot.slane %v2171_v44, %v2277_v29  ;;  %v1749_v44 = vpack.c.bf16 %v472_v47, %v470_v46  ;;  %1830 = vmatprep.subr.bf16.mxu1 %v1829_v58  ;;  %v1533_v27 = vld [vmem:[%s3072_s4 + $0x480] sm:$0xff]  ;;  %v1757_v28 = vpack.c.bf16 %v1456_v19, %v1454_v18  ;;  %v1455_v31 = vld [vmem:[%s3072_s4 + $0x210] sm:$0xff]  ;;  %v1458_v33 = vld [vmem:[%s3072_s4 + $0x228] sm:$0xff] }
  0x23   : > { %v1453_v30 = vld [vmem:[%s3072_s4 + $0x200] sm:$0xff]  ;;  %v1538_v35 = vld [vmem:[%s3072_s4 + $0x4a8] sm:$0xff]  ;;  %v1540_v36 = vld [vmem:[%s3072_s4 + $0x4b8] sm:$0xff] }
  0x24   : > { %v390_v5 = vmul.f32 %v383_v53, %v375_v54  ;;  %v392_v22 = vmul.f32 %v383_v53, %v377_v7  ;;  %v1537_v43 = vld [vmem:[%s3072_s4 + $0x4a0] sm:$0xff]  ;;  %v1539_v45 = vld [vmem:[%s3072_s4 + $0x4b0] sm:$0xff]  ;;  %v1841_v53 = vpack.c.bf16 %v1540_v36, %v1538_v35  ;;  %v1464_v54 = vld [vmem:[%s3072_s4 + $0x258] sm:$0xff] }
  0x25   : > { %1724 = vmatpush1.bf16.msra.mxu0 %v1723_v59  ;;  %v1525_v59 = vld [vmem:[%s3072_s4 + $0x440] sm:$0xff]  ;;  %v1542_v55 = vld [vmem:[%s3072_s4 + $0x4c8] sm:$0xff]  ;;  %v1843_v58 = vpack.c.bf16 %v1539_v45, %v1537_v43  ;;  %v1543_v63 = vld [vmem:[%s3072_s4 + $0x4d0] sm:$0xff] }
  0x26   : > { %1726 = vmatprep.subr.bf16.mxu0 %v1725_v61  ;;  %v2331_v61 = vld [vmem:[%s3073_s5] ss:$8 sm:$0x3]  ;;  %v407_v37 = vadd.f32 %v398_v4, %v392_v22  ;;  %v1463_v1 = vld [vmem:[%s3072_s4 + $0x250] sm:$0xff]  ;;  %v1472_v18 = vld [vmem:[%s3072_s4 + $0x298] sm:$0xff] }
  0x27   : > { %v2368_v11 = vrot.slane %v2331_v61, %v2160_v39  ;;  %v1457_v47 = vld [vmem:[%s3072_s4 + $0x220] sm:$0xff]  ;;  %v1547_v12 = vld [vmem:[%s3072_s4 + $0x4f0] sm:$0xff]  ;;  %v1478_v43 = vld [vmem:[%s3072_s4 + $0x2c8] sm:$0xff] }
  0x28   : > { %v411_v57 = vmax.f32 %v407_v37, 0.0  ;;  %v1541_v62 = vld [vmem:[%s3072_s4 + $0x4c0] sm:$0xff]  ;;  %v1555_v37 = vld [vmem:[%s3072_s4 + $0x530] sm:$0xff]  ;;  %v1480_v45 = vld [vmem:[%s3072_s4 + $0x2d8] sm:$0xff] }
  0x29   : > { %1728 = vmatpush1.bf16.msra.mxu0 %v1727_v2  ;;  %v473_v2 = vld [vmem:[%s3072_s4 + $0x1e0] sm:$0xff]  ;;  %v1847_v7 = vpack.c.bf16 %v1543_v63, %v1541_v62 }
  0x2a   : > { %1730 = vmatprep.subr.bf16.mxu0 %v1729_v3  ;;  %v475_v3 = vld [vmem:[%s3072_s4 + $0x1f0] sm:$0xff]  ;;  %v1545_v49 = vld [vmem:[%s3072_s4 + $0x4e0] sm:$0xff] }
  0x2b   : > { %v1755_v17 = vpack.c.bf16 %v475_v3, %v473_v2  ;;  %v1546_v3 = vld [vmem:[%s3072_s4 + $0x4e8] sm:$0xff]  ;;  %v1851_v19 = vpack.c.bf16 %v1547_v12, %v1545_v49  ;;  %v1473_v35 = vld [vmem:[%s3072_s4 + $0x2a0] sm:$0xff] }
  0x2c   : > { %v1481_v63 = vld [vmem:[%s3072_s4 + $0x2e0] sm:$0xff] }
  0x2d   : > { %1732 = vmatpush1.bf16.msra.mxu0 %v1731_v8  ;;  %v1831_v8 = vpack.c.bf16 %v1527_v60, %v1525_v59  ;;  %v1461_v60 = vld [vmem:[%s3072_s4 + $0x240] sm:$0xff] }
  0x2e   : > { %1734 = vmatprep.subr.bf16.mxu0 %v1733_v9  ;;  %v1751_v9 = vpack.c.bf16 %v471_v52, %v469_v51  ;;  %v1459_v51 = vld [vmem:[%s3072_s4 + $0x230] sm:$0xff]  ;;  %v1462_v52 = vld [vmem:[%s3072_s4 + $0x248] sm:$0xff]  ;;  %v1485_v49 = vld [vmem:[%s3072_s4 + $0x300] sm:$0xff] }
  0x2f   : > { %1832 = vmatpush1.bf16.msra.mxu1 %v1831_v8  ;;  %v1763_v59 = vpack.c.bf16 %v1459_v51, %v1457_v47  ;;  %v1765_v0 = vpack.c.bf16 %v1464_v54, %v1462_v52  ;;  %v1767_v8 = vpack.c.bf16 %v1463_v1, %v1461_v60  ;;  %v1477_v51 = vld [vmem:[%s3072_s4 + $0x2c0] sm:$0xff]  ;;  %v1559_v54 = vld [vmem:[%s3072_s4 + $0x550] sm:$0xff]  ;;  %v1484_v60 = vld [vmem:[%s3072_s4 + $0x2f8] sm:$0xff] }
  0x30   : > { %1834 = vmatprep.subr.bf16.mxu1 %v1833_v48  ;;  %v1561_v1 = vld [vmem:[%s3072_s4 + $0x560] sm:$0xff] }
  0x31   : > { %1736 = vmatpush1.bf16.msra.mxu0 %v1735_v14  ;;  %v566_v14 = vld [vmem:[%s2349_s23 + $0x8] sm:$0xff] }
  0x32   : > { %1738 = vmatprep.subr.bf16.mxu0 %v1737_v15  ;;  %v1534_v15 = vld [vmem:[%s3072_s4 + $0x488] sm:$0xff]  ;;  %v581_v24 = vmul.f32 %v2368_v11, %v566_v14  ;;  %v1467_v14 = vld [vmem:[%s3072_s4 + $0x270] sm:$0xff] }
  0x33   : > { %v1837_v26 = vpack.c.bf16 %v1536_v16, %v1534_v15  ;;  %1836 = vmatpush1.bf16.msra.mxu1 %v1835_v23  ;;  %v1550_v15 = vld [vmem:[%s3072_s4 + $0x508] sm:$0xff]  ;;  %v1552_v16 = vld [vmem:[%s3072_s4 + $0x518] sm:$0xff]  ;;  %v1549_v23 = vld [vmem:[%s3072_s4 + $0x500] sm:$0xff] }
  0x34   : > { %v596_v42 = vadd.f32 %v2393_v25, %v581_v24  ;;  %v1853_v22 = vpack.c.bf16 %v1552_v16, %v1550_v15  ;;  %v1551_v24 = vld [vmem:[%s3072_s4 + $0x510] sm:$0xff] }
  0x35   : > { %1740 = vmatpush1.bf16.msra.mxu0 %v1739_v20  ;;  %v405_v20 = vadd.f32 %v398_v4, %v390_v5  ;;  %1838 = vmatprep.subr.bf16.mxu1 %v1837_v26  ;;  %v1548_v4 = vld [vmem:[%s3072_s4 + $0x4f8] sm:$0xff]  ;;  %v1466_v5 = vld [vmem:[%s3072_s4 + $0x268] sm:$0xff]  ;;  %v1487_v16 = vld [vmem:[%s3072_s4 + $0x310] sm:$0xff] }
  0x36   : > { %1742 = vmatprep.subr.bf16.mxu0 %v1741_v21  ;;  %v408_v21 = vadd.f32 %v2191_v50, %v393_v6  ;;  %v1535_v50 = vld [vmem:[%s3072_s4 + $0x490] sm:$0xff]  ;;  %v1468_v6 = vld [vmem:[%s3072_s4 + $0x278] sm:$0xff]  ;;  %v1849_v48 = vpack.c.bf16 %v1548_v4, %v1546_v3 }
  0x37   : > { %v409_v32 = vmax.f32 %v405_v20, 0.0  ;;  %v1839_v38 = vpack.c.bf16 %v1535_v50, %v1533_v27  ;;  %v1471_v27 = vld [vmem:[%s3072_s4 + $0x290] sm:$0xff]  ;;  %v1554_v50 = vld [vmem:[%s3072_s4 + $0x528] sm:$0xff] }
  0x38   : > { %v412_v41 = vmax.f32 %v408_v21, 0.0  ;;  %v1469_v21 = vld [vmem:[%s3072_s4 + $0x280] sm:$0xff]  ;;  %v1483_v4 = vld [vmem:[%s3072_s4 + $0x2f0] sm:$0xff] }
  0x39   : > { %1744 = vmatpush1.bf16.msra.mxu0 %v1743_v34  ;;  %v1460_v34 = vld [vmem:[%s3072_s4 + $0x238] sm:$0xff]  ;;  %1840 = vmatpush1.bf16.msra.mxu1 %v1839_v38 }
  0x3a   : > { %1746 = vmatprep.subr.bf16.mxu0 %v1745_v40  ;;  %v1759_v40 = vpack.c.bf16 %v1455_v31, %v1453_v30  ;;  %v1761_v46 = vpack.c.bf16 %v1460_v34, %v1458_v33  ;;  %1842 = vmatprep.subr.bf16.mxu1 %v1841_v53  ;;  %v1474_v30 = vld [vmem:[%s3072_s4 + $0x2a8] sm:$0xff]  ;;  %v1476_v31 = vld [vmem:[%s3072_s4 + $0x2b8] sm:$0xff]  ;;  %v1855_v33 = vpack.c.bf16 %v1551_v24, %v1549_v23  ;;  %v1557_v53 = vld [vmem:[%s3072_s4 + $0x540] sm:$0xff] }
  0x3b   : > { %v1775_v34 = vpack.c.bf16 %v1471_v27, %v1469_v21  ;;  %v1777_v38 = vpack.c.bf16 %v1476_v31, %v1474_v30  ;;  %v1489_v23 = vld [vmem:[%s3072_s4 + $0x320] sm:$0xff]  ;;  %v1571_v27 = vld [vmem:[%s3072_s4 + $0x5b0] sm:$0xff]  ;;  %v1574_v30 = vld [vmem:[%s3072_s4 + $0x5c8] sm:$0xff] }
  0x3c   : > { %v1576_v31 = vld [vmem:[%s3072_s4 + $0x5d8] sm:$0xff] }
  0x3d   : > { %1748 = vmatpush1.bf16.msra.mxu0 %v1747_v56  ;;  %v1544_v56 = vld [vmem:[%s3072_s4 + $0x4d8] sm:$0xff]  ;;  %1844 = vmatpush1.bf16.msra.mxu1 %v1843_v58 }
  0x3e   : > { %1750 = vmatprep.subr.bf16.mxu0 %v1749_v44  ;;  %v600_v44 = vmax.f32 %v596_v42, 0.0  ;;  %v1845_v2 = vpack.c.bf16 %v1544_v56, %v1542_v55  ;;  %v1560_v42 = vld [vmem:[%s3072_s4 + $0x558] sm:$0xff]  ;;  %v1781_v55 = vpack.c.bf16 %v1480_v45, %v1478_v43  ;;  %v1479_v56 = vld [vmem:[%s3072_s4 + $0x2d0] sm:$0xff] }
  0x3f   : > { %v1564_v58 = vld [vmem:[%s3072_s4 + $0x578] sm:$0xff]  ;;  %v1783_v62 = vpack.c.bf16 %v1479_v56, %v1477_v51  ;;  %v1502_v51 = vld [vmem:[%s3072_s4 + $0x388] sm:$0xff]  ;;  %v1503_v56 = vld [vmem:[%s3072_s4 + $0x390] sm:$0xff] }
  0x40   : > { %1846 = vmatprep.subr.bf16.mxu1 %v1845_v2  ;;  %v1563_v2 = vld [vmem:[%s3072_s4 + $0x570] sm:$0xff] }
  0x41   : > { %1752 = vmatpush1.bf16.msra.mxu0 %v1751_v9  ;;  %v1465_v9 = vld [vmem:[%s3072_s4 + $0x260] sm:$0xff]  ;;  %1848 = vmatpush1.bf16.msra.mxu1 %v1847_v7  ;;  %v1486_v7 = vld [vmem:[%s3072_s4 + $0x308] sm:$0xff] }
  0x42   : > { %1754 = vmatprep.subr.bf16.mxu0 %v1753_v13  ;;  %v1769_v13 = vpack.c.bf16 %v1468_v6, %v1466_v5  ;;  %v1771_v20 = vpack.c.bf16 %v1467_v14, %v1465_v9  ;;  %1850 = vmatprep.subr.bf16.mxu1 %v1849_v48  ;;  %v1566_v5 = vld [vmem:[%s3072_s4 + $0x588] sm:$0xff]  ;;  %v1568_v6 = vld [vmem:[%s3072_s4 + $0x598] sm:$0xff]  ;;  %v1867_v9 = vpack.c.bf16 %v1563_v2, %v1561_v1  ;;  %v1567_v14 = vld [vmem:[%s3072_s4 + $0x590] sm:$0xff] }
  0x43   : > { %v1787_v48 = vpack.c.bf16 %v1483_v4, %v1481_v63  ;;  %v1869_v12 = vpack.c.bf16 %v1568_v6, %v1566_v5  ;;  %v1510_v63 = vld [vmem:[%s3072_s4 + $0x3c8] sm:$0xff]  ;;  %v573_v1 = vrot.slane %v2331_v61, %v2277_v29  ;;  %v1509_v5 = vld [vmem:[%s3072_s4 + $0x3c0] sm:$0xff]  ;;  %v1511_v6 = vld [vmem:[%s3072_s4 + $0x3d0] sm:$0xff] }
  0x44   : > { %v1516_v61 = vld [vmem:[%s3072_s4 + $0x3f8] sm:$0xff] }
  0x45   : > { %1756 = vmatpush1.bf16.msra.mxu0 %v1755_v17  ;;  %v1470_v17 = vld [vmem:[%s3072_s4 + $0x288] sm:$0xff]  ;;  %1852 = vmatpush1.bf16.msra.mxu1 %v1851_v19 }
  0x46   : > { %1758 = vmatprep.subr.bf16.mxu0 %v1757_v28  ;;  %v1773_v26 = vpack.c.bf16 %v1472_v18, %v1470_v17  ;;  %v1556_v28 = vld [vmem:[%s3072_s4 + $0x538] sm:$0xff]  ;;  %1854 = vmatprep.subr.bf16.mxu1 %v1853_v22  ;;  %v1570_v17 = vld [vmem:[%s3072_s4 + $0x5a8] sm:$0xff]  ;;  %v1791_v22 = vpack.c.bf16 %v1487_v16, %v1485_v49  ;;  %v1815_v49 = vpack.c.bf16 %v1511_v6, %v1509_v5  ;;  %v1515_v16 = vld [vmem:[%s3072_s4 + $0x3f0] sm:$0xff] }
  0x47   : > { %v1857_v36 = vpack.c.bf16 %v1556_v28, %v1554_v50  ;;  %v1572_v18 = vld [vmem:[%s3072_s4 + $0x5b8] sm:$0xff]  ;;  %v1490_v19 = vld [vmem:[%s3072_s4 + $0x328] sm:$0xff]  ;;  %v1491_v28 = vld [vmem:[%s3072_s4 + $0x330] sm:$0xff] }
  0x48   : > { %553 = vmatmul.mubr.f32.vlgmr.msra.gmra.mrb[0].mxu0 %v409_v32  ;;  %v1553_v32 = vld [vmem:[%s3072_s4 + $0x520] sm:$0xff]  ;;  %v1873_v24 = vpack.c.bf16 %v1572_v18, %v1570_v17  ;;  %v1590_v5 = vld [vmem:[%s3072_s4 + $0x638] sm:$0xff] }
  0x49   : > { %1760 = vmatpush1.bf16.msra.mxu0 %v1759_v40  ;;  %558 = vmatprep.mubr.f32.mxu0 %v412_v41  ;;  %v1475_v40 = vld [vmem:[%s3072_s4 + $0x2b0] sm:$0xff]  ;;  %v1558_v41 = vld [vmem:[%s3072_s4 + $0x548] sm:$0xff]  ;;  %v2760_v6 = vld [vmem:[%s3071_s3] sm:$0xff] }
  0x4a   : > { %1762 = vmatprep.subr.bf16.mxu0 %v1761_v46  ;;  %1856 = vmatpush1.bf16.msra.mxu1 %v1855_v33  ;;  %v1859_v46 = vpack.c.bf16 %v1555_v37, %v1553_v32  ;;  %v1779_v47 = vpack.c.bf16 %v1475_v40, %v1473_v35  ;;  %v1861_v52 = vpack.c.bf16 %v1560_v42, %v1558_v41  ;;  %v1494_v33 = vld [vmem:[%s3072_s4 + $0x348] sm:$0xff]  ;;  %v1495_v40 = vld [vmem:[%s3072_s4 + $0x350] sm:$0xff]  ;;  %v1500_v42 = vld [vmem:[%s3072_s4 + $0x378] sm:$0xff] }
  0x4b   : > { %1858 = vmatprep.subr.bf16.mxu1 %v1857_v36  ;;  %v1795_v36 = vpack.c.bf16 %v1491_v28, %v1489_v23  ;;  %v1877_v32 = vpack.c.bf16 %v1576_v31, %v1574_v30  ;;  %v1498_v41 = vld [vmem:[%s3072_s4 + $0x368] sm:$0xff]  ;;  %v1573_v23 = vld [vmem:[%s3072_s4 + $0x5c0] sm:$0xff]  ;;  %v1579_v30 = vld [vmem:[%s3072_s4 + $0x5f0] sm:$0xff] }
  0x4c   : > { %559 = vmatmul.mubr.f32.gmra.mrb[2].mxu0 %v411_v57  ;;  %v1562_v57 = vld [vmem:[%s3072_s4 + $0x568] sm:$0xff]  ;;  %v1801_v45 = vpack.c.bf16 %v1500_v42, %v1498_v41  ;;  %v1577_v28 = vld [vmem:[%s3072_s4 + $0x5e0] sm:$0xff] }
  0x4d   : > { %1764 = vmatpush1.bf16.msra.mxu0 %v1763_v59  ;;  %734 = vmatprep.mubr.f32.mxu0 %v600_v44  ;;  %v1482_v59 = vld [vmem:[%s3072_s4 + $0x2e8] sm:$0xff]  ;;  %v1863_v44 = vpack.c.bf16 %v1559_v54, %v1557_v53  ;;  %v1883_v31 = vpack.c.bf16 %v1579_v30, %v1577_v28 }
  0x4e   : > { %1766 = vmatprep.subr.bf16.mxu0 %v1765_v0  ;;  %1860 = vmatpush1.bf16.msra.mxu1 %v1859_v46  ;;  %v1865_v0 = vpack.c.bf16 %v1564_v58, %v1562_v57  ;;  %v1785_v3 = vpack.c.bf16 %v1484_v60, %v1482_v59  ;;  %v1497_v46 = vld [vmem:[%s3072_s4 + $0x360] sm:$0xff]  ;;  %v1506_v57 = vld [vmem:[%s3072_s4 + $0x3a8] sm:$0xff]  ;;  %v1508_v58 = vld [vmem:[%s3072_s4 + $0x3b8] sm:$0xff] }
  0x4f   : > { %1862 = vmatprep.subr.bf16.mxu1 %v1861_v52  ;;  %v1504_v52 = vld [vmem:[%s3072_s4 + $0x398] sm:$0xff]  ;;  %v1809_v60 = vpack.c.bf16 %v1508_v58, %v1506_v57 }
  0x50   : > { %v1805_v54 = vpack.c.bf16 %v1504_v52, %v1502_v51  ;;  %v750_v52 = vld [vmem:[%s354_s30 + $0x18] sm:$0xff] }
  0x51   : > { %1768 = vmatpush1.bf16.msra.mxu0 %v1767_v8  ;;  %v1488_v8 = vld [vmem:[%s3072_s4 + $0x318] sm:$0xff] }
  0x52   : > { %1770 = vmatprep.subr.bf16.mxu0 %v1769_v13  ;;  %1864 = vmatpush1.bf16.msra.mxu1 %v1863_v44  ;;  %v1565_v13 = vld [vmem:[%s3072_s4 + $0x580] sm:$0xff]  ;;  %v1789_v15 = vpack.c.bf16 %v1488_v8, %v1486_v7  ;;  %v568_v7 = vld [vmem:[%s2349_s23 + $0x18] sm:$0xff]  ;;  %v1514_v8 = vld [vmem:[%s3072_s4 + $0x3e8] sm:$0xff] }
  0x53   : > { %1866 = vmatprep.subr.bf16.mxu1 %v1865_v0  ;;  %v1871_v21 = vpack.c.bf16 %v1567_v14, %v1565_v13  ;;  %v1505_v44 = vld [vmem:[%s3072_s4 + $0x3a0] sm:$0xff]  ;;  %v1512_v0 = vld [vmem:[%s3072_s4 + $0x3d8] sm:$0xff]  ;;  %v567_v13 = vld [vmem:[%s2349_s23 + $0x10] sm:$0xff]  ;;  %v1817_v14 = vpack.c.bf16 %v1516_v61, %v1514_v8 }
  0x54   : > { %v1813_v4 = vpack.c.bf16 %v1512_v0, %v1510_v63  ;;  %v582_v18 = vmul.f32 %v573_v1, %v567_v13  ;;  %v1587_v61 = vld [vmem:[%s3072_s4 + $0x620] sm:$0xff] }
  0x55   : > { %1772 = vmatpush1.bf16.msra.mxu0 %v1771_v20  ;;  %v1492_v20 = vld [vmem:[%s3072_s4 + $0x338] sm:$0xff] }
  0x56   : > { %1774 = vmatprep.subr.bf16.mxu0 %v1773_v26  ;;  %1868 = vmatpush1.bf16.msra.mxu1 %v1867_v9  ;;  %v1569_v26 = vld [vmem:[%s3072_s4 + $0x5a0] sm:$0xff]  ;;  %v1793_v50 = vpack.c.bf16 %v1492_v20, %v1490_v19 }
  0x57   : > { %1870 = vmatprep.subr.bf16.mxu1 %v1869_v12  ;;  %v1875_v35 = vpack.c.bf16 %v1571_v27, %v1569_v26  ;;  %v583_v12 = vmul.f32 %v2368_v11, %v568_v7  ;;  %v1580_v27 = vld [vmem:[%s3072_s4 + $0x5f8] sm:$0xff] }
  0x59   : > { %1776 = vmatpush1.bf16.msra.mxu0 %v1775_v34  ;;  %v1496_v34 = vld [vmem:[%s3072_s4 + $0x358] sm:$0xff] }
  0x5a   : > { %1778 = vmatprep.subr.bf16.mxu0 %v1777_v38  ;;  %1872 = vmatpush1.bf16.msra.mxu1 %v1871_v21  ;;  %v1797_v37 = vpack.c.bf16 %v1496_v34, %v1494_v33  ;;  %v1493_v38 = vld [vmem:[%s3072_s4 + $0x340] sm:$0xff] }
  0x5b   : > { %1874 = vmatprep.subr.bf16.mxu1 %v1873_v24  ;;  %v1799_v43 = vpack.c.bf16 %v1495_v40, %v1493_v38  ;;  %v1575_v24 = vld [vmem:[%s3072_s4 + $0x5d0] sm:$0xff]  ;;  %v1450_v33 = vld [vmem:[%s3073_s5 + $0x4] ss:$8 sm:$0x3] }
  0x5c   : > { %v1879_v26 = vpack.c.bf16 %v1575_v24, %v1573_v23  ;;  %v481_v34 = vrot.slane %v1450_v33, %v2277_v29  ;;  %v748_v40 = vld [vmem:[%s354_s30 + $0x8] sm:$0xff] }
  0x5d   : > { %1780 = vmatpush1.bf16.msra.mxu0 %v1779_v47  ;;  %v1499_v47 = vld [vmem:[%s3072_s4 + $0x370] sm:$0xff] }
  0x5e   : > { %1782 = vmatprep.subr.bf16.mxu0 %v1781_v55  ;;  %1876 = vmatpush1.bf16.msra.mxu1 %v1875_v35  ;;  %v1803_v53 = vpack.c.bf16 %v1499_v47, %v1497_v46  ;;  %v1501_v55 = vld [vmem:[%s3072_s4 + $0x380] sm:$0xff]  ;;  %v485_v35 = vrot.slane %v1450_v33, %v2160_v39  ;;  %v1605_v33 = vld [vmem:[%s3072_s4 + $0x6b0] sm:$0xff] }
  0x5f   : > { %1878 = vmatprep.subr.bf16.mxu1 %v1877_v32  ;;  %v1807_v59 = vpack.c.bf16 %v1503_v56, %v1501_v55  ;;  %v747_v32 = vld [vmem:[%s354_s30] sm:$0xff]  ;;  %v2014_v56 = vmov 0.0  }
  0x61   : > { %1784 = vmatpush1.bf16.msra.mxu0 %v1783_v62  ;;  %v1507_v62 = vld [vmem:[%s3072_s4 + $0x3b0] sm:$0xff] }
  0x62   : > { %1786 = vmatprep.subr.bf16.mxu0 %v1785_v3  ;;  %v1811_v2 = vpack.c.bf16 %v1507_v62, %v1505_v44  ;;  %v565_v3 = vld [vmem:[%s2349_s23] sm:$0xff]  ;;  %1880 = vmatpush1.bf16.msra.mxu1 %v1879_v26 }
  0x63   : > { %v580_v9 = vmul.f32 %v573_v1, %v565_v3  ;;  %v1585_v3 = vld [vmem:[%s3072_s4 + $0x610] sm:$0xff]  ;;  %v1599_v26 = vld [vmem:[%s3072_s4 + $0x680] sm:$0xff] }
  0x65   : > { %1788 = vmatpush1.bf16.msra.mxu0 %v1787_v48  ;;  %v588_v48 = vrot.slane %v2364_v10, %v2277_v29  ;;  %v598_v10 = vadd.f32 %v2393_v25, %v583_v12  ;;  %v1578_v25 = vld [vmem:[%s3072_s4 + $0x5e8] sm:$0xff] }
  0x66   : > { %1790 = vmatprep.subr.bf16.mxu0 %v1789_v15  ;;  %v1513_v15 = vld [vmem:[%s3072_s4 + $0x3e0] sm:$0xff]  ;;  %v2780_v12 = vld [vmem:[%s3071_s3 + $0x8] sm:$0xff] }
  0x67   : > { %v595_v17 = vadd.f32 %v588_v48, %v580_v9  ;;  %v1819_v19 = vpack.c.bf16 %v1515_v16, %v1513_v15  ;;  %v597_v11 = vadd.f32 %v588_v48, %v582_v18  ;;  %v602_v21 = vmax.f32 %v598_v10, 0.0  ;;  %v1589_v9 = vld [vmem:[%s3072_s4 + $0x630] sm:$0xff]  ;;  %v1592_v48 = vld [vmem:[%s3072_s4 + $0x648] sm:$0xff]  ;;  %v1591_v15 = vld [vmem:[%s3072_s4 + $0x640] sm:$0xff] }
  0x68   : > { %v1895_v13 = vpack.c.bf16 %v1589_v9, %v1587_v61  ;;  %v1593_v16 = vld [vmem:[%s3072_s4 + $0x650] sm:$0xff]  ;;  %v1598_v18 = vld [vmem:[%s3072_s4 + $0x678] sm:$0xff]  ;;  %v1627_v9 = vld [vmem:[%s3072_s4 + $0x760] sm:$0xff] }
  0x69   : > { %1792 = vmatpush1.bf16.msra.mxu0 %v1791_v22  ;;  %v599_v20 = vmax.f32 %v595_v17, 0.0  ;;  %v601_v22 = vmax.f32 %v597_v11, 0.0  ;;  %v1596_v17 = vld [vmem:[%s3072_s4 + $0x668] sm:$0xff]  ;;  %v1597_v11 = vld [vmem:[%s3072_s4 + $0x670] sm:$0xff] }
  0x6a   : > { %1794 = vmatprep.subr.bf16.mxu0 %v1793_v50  ;;  %v1881_v50 = vpack.c.bf16 %v1580_v27, %v1578_v25  ;;  %v1901_v10 = vpack.c.bf16 %v1598_v18, %v1596_v17  ;;  %v1601_v25 = vld [vmem:[%s3072_s4 + $0x690] sm:$0xff]  ;;  %v1604_v27 = vld [vmem:[%s3072_s4 + $0x6a8] sm:$0xff] }
  0x6b   : > { %v1907_v28 = vpack.c.bf16 %v1601_v25, %v1599_v26  ;;  %v1633_v17 = vld [vmem:[%s3072_s4 + $0x790] sm:$0xff]  ;;  %v1636_v18 = vld [vmem:[%s3072_s4 + $0x7a8] sm:$0xff]  ;;  %v1639_v25 = vld [vmem:[%s3072_s4 + $0x7c0] sm:$0xff] }
  0x6c   : > { %1882 = vmatprep.subr.bf16.mxu1 %v1881_v50  ;;  %v1606_v50 = vld [vmem:[%s3072_s4 + $0x6b8] sm:$0xff] }
  0x6d   : > { %1796 = vmatpush1.bf16.msra.mxu0 %v1795_v36  ;;  %1884 = vmatpush1.bf16.msra.mxu1 %v1883_v31  ;;  %v1909_v30 = vpack.c.bf16 %v1606_v50, %v1604_v27  ;;  %v1603_v31 = vld [vmem:[%s3072_s4 + $0x6a0] sm:$0xff]  ;;  %v1641_v27 = vld [vmem:[%s3072_s4 + $0x7d0] sm:$0xff] }
  0x6e   : > { %1798 = vmatprep.subr.bf16.mxu0 %v1797_v37  ;;  %v1947_v50 = vpack.c.bf16 %v1641_v27, %v1639_v25  ;;  %v1258_v25 = vld [vmem:[%s3074_s6 + $0xe0] sm:$0xff]  ;;  %v1259_v27 = vld [vmem:[%s3074_s6 + $0xe8] sm:$0xff] }
  0x71   : > { %1800 = vmatpush1.bf16.msra.mxu0 %v1799_v43 }
  0x72   : > { %1802 = vmatprep.subr.bf16.mxu0 %v1801_v45  ;;  %v749_v45 = vld [vmem:[%s354_s30 + $0x10] sm:$0xff] }
  0x75   : > { %1804 = vmatpush1.bf16.msra.mxu0 %v1803_v53 }
  0x76   : > { %1806 = vmatprep.subr.bf16.mxu0 %v1805_v54 }
  0x79   : > { %1808 = vmatpush1.bf16.msra.mxu0 %v1807_v59  ;;  %v1584_v59 = vld [vmem:[%s3072_s4 + $0x608] sm:$0xff] }
  0x7a   : > { %1810 = vmatprep.subr.bf16.mxu0 %v1809_v60  ;;  %v1586_v60 = vld [vmem:[%s3072_s4 + $0x618] sm:$0xff] }
  0x7b   : > { %v1889_v1 = vpack.c.bf16 %v1586_v60, %v1584_v59 }
  0x7d   : > { %1812 = vmatpush1.bf16.msra.mxu0 %v1811_v2  ;;  %v1583_v2 = vld [vmem:[%s3072_s4 + $0x600] sm:$0xff] }
  0x7e   : > { %1814 = vmatprep.subr.bf16.mxu0 %v1813_v4  ;;  %v1588_v4 = vld [vmem:[%s3072_s4 + $0x628] sm:$0xff]  ;;  %v1891_v7 = vpack.c.bf16 %v1585_v3, %v1583_v2  ;;  %v1623_v3 = vld [vmem:[%s3072_s4 + $0x740] sm:$0xff] }
  0x7f   : > { %v1893_v8 = vpack.c.bf16 %v1590_v5, %v1588_v4  ;;  %v1625_v4 = vld [vmem:[%s3072_s4 + $0x750] sm:$0xff]  ;;  %v1628_v5 = vld [vmem:[%s3072_s4 + $0x768] sm:$0xff] }
  0x81   : > { %1816 = vmatpush1.bf16.msra.mxu0 %v1815_v49  ;;  %v1594_v49 = vld [vmem:[%s3072_s4 + $0x658] sm:$0xff] }
  0x82   : > { %1818 = vmatprep.subr.bf16.mxu0 %v1817_v14  ;;  %v1897_v14 = vpack.c.bf16 %v1594_v49, %v1592_v48  ;;  %v1629_v48 = vld [vmem:[%s3072_s4 + $0x770] sm:$0xff]  ;;  %v1632_v49 = vld [vmem:[%s3072_s4 + $0x788] sm:$0xff] }
  0x85   : > { %1820 = vmatpush1.bf16.msra.mxu0 %v1819_v19  ;;  %v1899_v19 = vpack.c.bf16 %v1593_v16, %v1591_v15  ;;  %v1631_v16 = vld [vmem:[%s3072_s4 + $0x780] sm:$0xff] }
  0x88   : > { %735 = vmatmul.mubr.f32.vlgmr.msra.gmra.mrb[0].mxu0 %v599_v20  ;;  %v1595_v20 = vld [vmem:[%s3072_s4 + $0x660] sm:$0xff] }
  0x89   : > { %740 = vmatprep.mubr.f32.mxu0 %v602_v21  ;;  %v1600_v21 = vld [vmem:[%s3072_s4 + $0x688] sm:$0xff]  ;;  %v1903_v23 = vpack.c.bf16 %v1597_v11, %v1595_v20  ;;  %v1635_v11 = vld [vmem:[%s3072_s4 + $0x7a0] sm:$0xff] }
  0x8c   : > { %741 = vmatmul.mubr.f32.gmra.mrb[2].mxu0 %v601_v22  ;;  %v1602_v22 = vld [vmem:[%s3072_s4 + $0x698] sm:$0xff] }
  0x8d   : > { %v1905_v24 = vpack.c.bf16 %v1602_v22, %v1600_v21  ;;  %v1637_v21 = vld [vmem:[%s3072_s4 + $0x7b0] sm:$0xff]  ;;  %v1640_v22 = vld [vmem:[%s3072_s4 + $0x7c8] sm:$0xff] }
 0x15b   : > { %v736_v36 = vpop.f32.mrb[0].mxu0 }
 0x15c   : > { %v1989_v37 = vadd.f32 %v736_v36, %v481_v34  ;;  %v738_v38 = vpop.f32.mrb[1].mxu0  ;;  %v1911_v36 = vpack.c.bf16 %v1605_v33, %v1603_v31  ;;  %v1643_v33 = vld [vmem:[%s3072_s4 + $0x7e0] sm:$0xff] }
 0x15d   : > { %v1990_v41 = vadd.f32 %v738_v38, %v485_v35  ;;  %v1609_v38 = vld [vmem:[%s3072_s4 + $0x6d0] sm:$0xff] }
 0x15e   : > { %v751_v42 = vadd.f32 %v1989_v37, %v747_v32  ;;  %v1607_v37 = vld [vmem:[%s3072_s4 + $0x6c0] sm:$0xff] }
 0x15f   : > { %v742_v43 = vpop.f32.mrb[2].mxu0  ;;  %v752_v46 = vadd.f32 %v1990_v41, %v748_v40  ;;  %v1612_v40 = vld [vmem:[%s3072_s4 + $0x6e8] sm:$0xff]  ;;  %v1614_v41 = vld [vmem:[%s3072_s4 + $0x6f8] sm:$0xff] }
 0x160   : > { %v1991_v47 = vadd.f32 %v742_v43, %v481_v34  ;;  %v744_v51 = vpop.f32.mrb[3].mxu0  ;;  %v1608_v34 = vld [vmem:[%s3072_s4 + $0x6c8] sm:$0xff]  ;;  %v1917_v43 = vpack.c.bf16 %v1614_v41, %v1612_v40 }
 0x161   : > { %v1992_v53 = vadd.f32 %v744_v51, %v485_v35  ;;  %884 = vmatprep.mubr.f32.mxu1 %v752_v46  ;;  %v1610_v35 = vld [vmem:[%s3072_s4 + $0x6d8] sm:$0xff]  ;;  %v1613_v46 = vld [vmem:[%s3072_s4 + $0x6f0] sm:$0xff] }
 0x162   : > { %v753_v54 = vadd.f32 %v1991_v47, %v749_v45  ;;  %885 = vmatmul.mubr.f32.vlgmr.msra.gmra.mrb[0].mxu1 %v751_v42  ;;  %v1913_v32 = vpack.c.bf16 %v1610_v35, %v1608_v34  ;;  %v1915_v42 = vpack.c.bf16 %v1609_v38, %v1607_v37  ;;  %v1611_v45 = vld [vmem:[%s3072_s4 + $0x6e0] sm:$0xff]  ;;  %v1616_v47 = vld [vmem:[%s3072_s4 + $0x708] sm:$0xff]  ;;  %v1618_v51 = vld [vmem:[%s3072_s4 + $0x718] sm:$0xff] }
 0x163   : > { %v754_v55 = vadd.f32 %v1992_v53, %v750_v52  ;;  %v1919_v52 = vpack.c.bf16 %v1613_v46, %v1611_v45  ;;  %v1921_v53 = vpack.c.bf16 %v1618_v51, %v1616_v47  ;;  %v1645_v34 = vld [vmem:[%s3072_s4 + $0x7f0] sm:$0xff] }
 0x164   : > { %v1951_v35 = vpack.c.bf16 %v1645_v34, %v1643_v33 }
 0x165   : > { %890 = vmatprep.mubr.f32.mxu1 %v754_v55  ;;  %v1617_v55 = vld [vmem:[%s3072_s4 + $0x710] sm:$0xff] }
 0x166   : > { %891 = vmatmul.mubr.f32.gmra.mrb[2].mxu1 %v753_v54  ;;  %v1615_v54 = vld [vmem:[%s3072_s4 + $0x700] sm:$0xff] }
 0x167   : > { %979 = vmatprep.mubr.f32.mxu1 %v2014_v56  ;;  %v1923_v59 = vpack.c.bf16 %v1617_v55, %v1615_v54  ;;  %v1246_v55 = vld [vmem:[%s3074_s6 + $0x80] sm:$0xff] }
 0x235   : > { %v886_v57 = vpop.f32.mrb[0].mxu1 }
 0x236   : > { %v888_v58 = vpop.f32.mrb[1].mxu1 }
 0x239   : > { %v892_v44 = vpop.f32.mrb[2].mxu1 }
 0x23a   : > { %v1887_v62 = vpack.c.bf16 %v892_v44, %v886_v57  ;;  %v894_v63 = vpop.f32.mrb[3].mxu1  ;;  %v1620_v57 = vld [vmem:[%s3072_s4 + $0x728] sm:$0xff]  ;;  %v1619_v44 = vld [vmem:[%s3072_s4 + $0x720] sm:$0xff] }
 0x23b   : > { %v1885_v0 = vpack.c.bf16 %v894_v63, %v888_v58  ;;  %v1622_v58 = vld [vmem:[%s3072_s4 + $0x738] sm:$0xff]  ;;  %v1624_v63 = vld [vmem:[%s3072_s4 + $0x748] sm:$0xff] }
 0x23c   : > { %v1925_v60 = vpack.c.bf16 %v1622_v58, %v1620_v57  ;;  %v1247_v57 = vld [vmem:[%s3074_s6 + $0x88] sm:$0xff]  ;;  %v1230_v58 = vld [vmem:[%s3074_s6] sm:$0xff] }
 0x23d   : > { %1886 = vmatprep.subr.bf16.mxu1 %v1885_v0  ;;  %v1626_v0 = vld [vmem:[%s3072_s4 + $0x758] sm:$0xff] }
 0x23e   : > { %1888 = vmatpush1.bf16.msra.mxu1 %v1887_v62  ;;  %v1621_v62 = vld [vmem:[%s3072_s4 + $0x730] sm:$0xff]  ;;  %v1929_v2 = vpack.c.bf16 %v1626_v0, %v1624_v63 }
 0x23f   : > { %1890 = vmatprep.subr.bf16.mxu1 %v1889_v1  ;;  %v1927_v1 = vpack.c.bf16 %v1621_v62, %v1619_v44  ;;  %v1248_v44 = vld [vmem:[%s3074_s6 + $0x90] sm:$0xff]  ;;  %v1249_v62 = vld [vmem:[%s3074_s6 + $0x98] sm:$0xff] }
 0x240   : > { %v1961_v0 = vpack.c.bf16 %v1249_v62, %v1248_v44 }
 0x241   : > { %1581 = vmatmul.mubr.msk.f32.vlgmr.msra.gmra.mrb[4].mxu1 %vm908_vm0, %v2760_v6 }
 0x242   : > { %985 = vmatprep.mubr.f32.mxu1 %v2014_v56  ;;  %1892 = vmatpush1.bf16.msra.mxu1 %v1891_v7  ;;  %v1630_v7 = vld [vmem:[%s3072_s4 + $0x778] sm:$0xff] }
 0x243   : > { %1894 = vmatprep.subr.bf16.mxu1 %v1893_v8  ;;  %v1931_v8 = vpack.c.bf16 %v1625_v4, %v1623_v3  ;;  %v1933_v61 = vpack.c.bf16 %v1630_v7, %v1628_v5  ;;  %v1250_v3 = vld [vmem:[%s3074_s6 + $0xa0] sm:$0xff]  ;;  %v1251_v4 = vld [vmem:[%s3074_s6 + $0xa8] sm:$0xff] }
 0x244   : > { %v1965_v7 = vpack.c.bf16 %v1251_v4, %v1250_v3 }
 0x245   : > { %1582 = vmatmul.mubr.msk.f32.gmra.mrb[6].mxu1 %vm908_vm0, %v2780_v12 }
 0x246   : > { %1896 = vmatpush1.bf16.msra.mxu1 %v1895_v13  ;;  %v1634_v13 = vld [vmem:[%s3072_s4 + $0x798] sm:$0xff] }
 0x247   : > { %1898 = vmatprep.subr.bf16.mxu1 %v1897_v14  ;;  %v1935_v14 = vpack.c.bf16 %v1629_v48, %v1627_v9  ;;  %v1937_v15 = vpack.c.bf16 %v1634_v13, %v1632_v49  ;;  %v1252_v9 = vld [vmem:[%s3074_s6 + $0xb0] sm:$0xff]  ;;  %v1253_v48 = vld [vmem:[%s3074_s6 + $0xb8] sm:$0xff] }
 0x248   : > { %v1969_v13 = vpack.c.bf16 %v1253_v48, %v1252_v9 }
 0x24a   : > { %1900 = vmatpush1.bf16.msra.mxu1 %v1899_v19  ;;  %v1638_v19 = vld [vmem:[%s3072_s4 + $0x7b8] sm:$0xff] }
 0x24b   : > { %1902 = vmatprep.subr.bf16.mxu1 %v1901_v10  ;;  %v1939_v10 = vpack.c.bf16 %v1633_v17, %v1631_v16  ;;  %v1941_v20 = vpack.c.bf16 %v1638_v19, %v1636_v18  ;;  %v1254_v16 = vld [vmem:[%s3074_s6 + $0xc0] sm:$0xff]  ;;  %v1255_v17 = vld [vmem:[%s3074_s6 + $0xc8] sm:$0xff] }
 0x24c   : > { %v1973_v19 = vpack.c.bf16 %v1255_v17, %v1254_v16 }
 0x24e   : > { %1904 = vmatpush1.bf16.msra.mxu1 %v1903_v23  ;;  %v1642_v23 = vld [vmem:[%s3072_s4 + $0x7d8] sm:$0xff] }
 0x24f   : > { %1906 = vmatprep.subr.bf16.mxu1 %v1905_v24  ;;  %v1943_v24 = vpack.c.bf16 %v1637_v21, %v1635_v11  ;;  %v1945_v26 = vpack.c.bf16 %v1642_v23, %v1640_v22  ;;  %v1256_v11 = vld [vmem:[%s3074_s6 + $0xd0] sm:$0xff]  ;;  %v1257_v21 = vld [vmem:[%s3074_s6 + $0xd8] sm:$0xff] }
 0x250   : > { %v1977_v23 = vpack.c.bf16 %v1257_v21, %v1256_v11 }
 0x252   : > { %1908 = vmatpush1.bf16.msra.mxu1 %v1907_v28  ;;  %v1644_v28 = vld [vmem:[%s3072_s4 + $0x7e8] sm:$0xff] }
 0x253   : > { %1910 = vmatprep.subr.bf16.mxu1 %v1909_v30  ;;  %v1646_v30 = vld [vmem:[%s3072_s4 + $0x7f8] sm:$0xff] }
 0x254   : > { %v1949_v31 = vpack.c.bf16 %v1646_v30, %v1644_v28  ;;  %v1981_v28 = vpack.c.bf16 %v1259_v27, %v1258_v25 }
 0x256   : > { %1912 = vmatpush1.bf16.msra.mxu1 %v1911_v36  ;;  %v1451_v36 = vld [vmem:[%s3073_s5 + $0x5] ss:$8 sm:$0x3] }
 0x257   : > { %1914 = vmatprep.subr.bf16.mxu1 %v1913_v32  ;;  %v901_v32 = vrot.slane %v1451_v36, %v2277_v29  ;;  %v905_v37 = vrot.slane %v1451_v36, %v2160_v39 }
 0x25a   : > { %1916 = vmatpush1.bf16.msra.mxu1 %v1915_v42 }
 0x25b   : > { %1918 = vmatprep.subr.bf16.mxu1 %v1917_v43 }
 0x25e   : > { %1920 = vmatpush1.bf16.msra.mxu1 %v1919_v52 }
 0x25f   : > { %1922 = vmatprep.subr.bf16.mxu1 %v1921_v53 }
 0x262   : > { %1924 = vmatpush1.bf16.msra.mxu1 %v1923_v59  ;;  %v1957_v59 = vpack.c.bf16 %v1247_v57, %v1246_v55 }
 0x263   : > { %1926 = vmatprep.subr.bf16.mxu1 %v1925_v60  ;;  %v1231_v60 = vld [vmem:[%s3074_s6 + $0x8] sm:$0xff] }
 0x264   : > { %v1959_v63 = vpack.c.bf16 %v1231_v60, %v1230_v58  ;;  %1958 = vmatprep.subr.bf16.mxu0 %v1957_v59 }
 0x266   : > { %1928 = vmatpush1.bf16.msra.mxu1 %v1927_v1  ;;  %v1232_v1 = vld [vmem:[%s3074_s6 + $0x10] sm:$0xff]  ;;  %1960 = vmatpush3.bf16.msra.mxu0 %v1959_v63 }
 0x267   : > { %1930 = vmatprep.subr.bf16.mxu1 %v1929_v2  ;;  %v1233_v2 = vld [vmem:[%s3074_s6 + $0x18] sm:$0xff]  ;;  %1962 = vmatprep.subr.bf16.mxu0 %v1961_v0 }
 0x268   : > { %v1963_v5 = vpack.c.bf16 %v1233_v2, %v1232_v1 }
 0x26a   : > { %1932 = vmatpush1.bf16.msra.mxu1 %v1931_v8  ;;  %v1234_v8 = vld [vmem:[%s3074_s6 + $0x20] sm:$0xff]  ;;  %1964 = vmatpush3.bf16.msra.mxu0 %v1963_v5 }
 0x26b   : > { %1934 = vmatprep.subr.bf16.mxu1 %v1933_v61  ;;  %v1235_v61 = vld [vmem:[%s3074_s6 + $0x28] sm:$0xff]  ;;  %1966 = vmatprep.subr.bf16.mxu0 %v1965_v7 }
 0x26c   : > { %v1967_v49 = vpack.c.bf16 %v1235_v61, %v1234_v8 }
 0x26e   : > { %1936 = vmatpush1.bf16.msra.mxu1 %v1935_v14  ;;  %v1236_v14 = vld [vmem:[%s3074_s6 + $0x30] sm:$0xff]  ;;  %1968 = vmatpush3.bf16.msra.mxu0 %v1967_v49 }
 0x26f   : > { %1938 = vmatprep.subr.bf16.mxu1 %v1937_v15  ;;  %v1237_v15 = vld [vmem:[%s3074_s6 + $0x38] sm:$0xff]  ;;  %1970 = vmatprep.subr.bf16.mxu0 %v1969_v13 }
 0x270   : > { %v1971_v18 = vpack.c.bf16 %v1237_v15, %v1236_v14 }
 0x272   : > { %1940 = vmatpush1.bf16.msra.mxu1 %v1939_v10  ;;  %v1238_v10 = vld [vmem:[%s3074_s6 + $0x40] sm:$0xff]  ;;  %1972 = vmatpush3.bf16.msra.mxu0 %v1971_v18 }
 0x273   : > { %1942 = vmatprep.subr.bf16.mxu1 %v1941_v20  ;;  %v1239_v20 = vld [vmem:[%s3074_s6 + $0x48] sm:$0xff]  ;;  %1974 = vmatprep.subr.bf16.mxu0 %v1973_v19 }
 0x274   : > { %v1975_v22 = vpack.c.bf16 %v1239_v20, %v1238_v10 }
 0x276   : > { %1944 = vmatpush1.bf16.msra.mxu1 %v1943_v24  ;;  %v1240_v24 = vld [vmem:[%s3074_s6 + $0x50] sm:$0xff]  ;;  %1976 = vmatpush3.bf16.msra.mxu0 %v1975_v22 }
 0x277   : > { %1946 = vmatprep.subr.bf16.mxu1 %v1945_v26  ;;  %v1241_v26 = vld [vmem:[%s3074_s6 + $0x58] sm:$0xff]  ;;  %1978 = vmatprep.subr.bf16.mxu0 %v1977_v23 }
 0x27a   : > { %1948 = vmatpush1.bf16.msra.mxu1 %v1947_v50  ;;  %v1979_v50 = vpack.c.bf16 %v1241_v26, %v1240_v24 }
 0x27b   : > { %1950 = vmatprep.subr.bf16.mxu1 %v1949_v31 }
 0x27c   : > { %1980 = vmatpush3.bf16.msra.mxu0 %v1979_v50 }
 0x27d   : > { %1982 = vmatprep.subr.bf16.mxu0 %v1981_v28 }
 0x27e   : > { %1952 = vmatpush1.bf16.msra.mxu1 %v1951_v35 }
 0x314   : > { %v981_v38 = vpop.f32.mrb[4].mxu1 }
 0x315   : > { %v982_v40 = vadd.f32 %v981_v38, %v901_v32  ;;  %v983_v41 = vpop.f32.mrb[5].mxu1 }
 0x316   : > { %v984_v42 = vadd.f32 %v983_v41, %v905_v37  ;;  %v1245_v41 = vld [vmem:[%s3074_s6 + $0x78] sm:$0xff] }
 0x317   : > { %v992_v46 = vmax.f32 %v982_v40, 0.0  ;;  %v1260_v40 = vld [vmem:[%s3074_s6 + $0xf0] sm:$0xff] }
 0x318   : > { %v993_v43 = vmax.f32 %v984_v42, 0.0  ;;  %v987_v45 = vpop.f32.mrb[6].mxu1 }
 0x319   : > { %v988_v47 = vadd.f32 %v987_v45, %v901_v32  ;;  %v989_v51 = vpop.f32.mrb[7].mxu1  ;;  %v1242_v32 = vld [vmem:[%s3074_s6 + $0x60] sm:$0xff] }
 0x31a   : > { %v990_v52 = vadd.f32 %v989_v51, %v905_v37  ;;  %1125 = vmatprep.mubr.f32.mxu1 %v993_v43  ;;  %v1243_v37 = vld [vmem:[%s3074_s6 + $0x68] sm:$0xff] }
 0x31b   : > { %1126 = vmatmul.mubr.f32.vlgmr.msra.gmra.mrb[8].mxu1 %v992_v46  ;;  %v994_v54 = vmax.f32 %v988_v47, 0.0  ;;  %v1983_v38 = vpack.c.bf16 %v1243_v37, %v1242_v32  ;;  %v1452_v43 = vld [vmem:[%s3073_s5 + $0x6] ss:$8 sm:$0x3] }
 0x31c   : > { %v995_v53 = vmax.f32 %v990_v52, 0.0  ;;  %v1142_v45 = vrot.slane %v1452_v43, %v2277_v29  ;;  %v1146_v46 = vrot.slane %v1452_v43, %v2160_v39  ;;  %v1649_v39 = vld [vmem:[%s3075_s7] ss:$0 sm:$0xff] }
 0x31d   : > { %1984 = vmatpush3.bf16.msra.mxu0 %v1983_v38 }
 0x31e   : > { %1131 = vmatprep.mubr.f32.mxu1 %v995_v53 }
 0x31f   : > { %1132 = vmatmul.mubr.f32.gmra.mrb[10].mxu1 %v994_v54 }
 0x320   : > { %1213 = vmatprep.mubr.f32.mxu1 %v2014_v56 }
 0x3ee   : > { %v1127_v30 = vpop.f32.mrb[8].mxu1 }
 0x3ef   : > { %v1129_v31 = vpop.f32.mrb[9].mxu1 }
 0x3f2   : > { %v1133_v33 = vpop.f32.mrb[10].mxu1 }
 0x3f3   : > { %v1955_v34 = vpack.c.bf16 %v1133_v33, %v1127_v30  ;;  %v1135_v35 = vpop.f32.mrb[11].mxu1 }
 0x3f4   : > { %v1953_v36 = vpack.c.bf16 %v1135_v35, %v1129_v31 }
 0x3f6   : > { %1954 = vmatprep.subr.bf16.mxu1 %v1953_v36 }
 0x3f7   : > { %1956 = vmatpush1.bf16.msra.mxu1 %v1955_v34 }
 0x3fa   : > { %1647 = vmatmul.mubr.msk.f32.vlgmr.msra.gmra.mrb[12].mxu1 %vm908_vm0, %v2760_v6 }
 0x3fb   : > { %1219 = vmatprep.mubr.f32.mxu1 %v2014_v56  ;;  %v1261_v56 = vld [vmem:[%s3074_s6 + $0xf8] sm:$0xff] }
 0x3fc   : > { %v1985_v6 = vpack.c.bf16 %v1261_v56, %v1260_v40 }
 0x3fe   : > { %1648 = vmatmul.mubr.msk.f32.gmra.mrb[14].mxu1 %vm908_vm0, %v2780_v12  ;;  %v1244_v12 = vld [vmem:[%s3074_s6 + $0x70] sm:$0xff]  ;;  %1986 = vmatprep.subr.bf16.mxu0 %v1985_v6 }
 0x3ff   : > { %v1987_v42 = vpack.c.bf16 %v1245_v41, %v1244_v12 }
 0x401   : > { %1988 = vmatpush3.bf16.msra.mxu0 %v1987_v42 }
 0x4cd   : > { %v1215_v47 = vpop.f32.mrb[12].mxu1 }
 0x4ce   : > { %v1216_v51 = vadd.f32 %v1215_v47, %v1142_v45  ;;  %v1217_v52 = vpop.f32.mrb[13].mxu1 }
 0x4cf   : > { %v1218_v53 = vadd.f32 %v1217_v52, %v1146_v46 }
 0x4d0   : > { %v1226_v57 = vmax.f32 %v1216_v51, 0.0 }
 0x4d1   : > { %v1227_v54 = vmax.f32 %v1218_v53, 0.0  ;;  %v1221_v55 = vpop.f32.mrb[14].mxu1 }
 0x4d2   : > { %v1222_v58 = vadd.f32 %v1221_v55, %v1142_v45  ;;  %v1223_v59 = vpop.f32.mrb[15].mxu1 }
 0x4d3   : > { %v1224_v60 = vadd.f32 %v1223_v59, %v1146_v46  ;;  %1333 = vmatprep.mubr.f32.mxu0 %v1227_v54 }
 0x4d4   : > { %1334 = vmatmul.mubr.f32.vlgmr.msra.gmra.mrb[4].mxu0 %v1226_v57  ;;  %v1228_v62 = vmax.f32 %v1222_v58, 0.0 }
 0x4d5   : > { %v1229_v44 = vmax.f32 %v1224_v60, 0.0 }
 0x4d7   : > { %1338 = vmatprep.mubr.f32.mxu0 %v1229_v44 }
 0x4d8   : > { %1339 = vmatmul.mubr.f32.gmra.mrb[6].mxu0 %v1228_v62 }
 0x5a7   : > { %v1687_v29 = vpop.f32.mrb[4].mxu0 }
 0x5a8   : > { %v1688_v63 = vpop.f32.mrb[5].mxu0 }
 0x5a9   : > { %v1689_v0 = vadd.f32 %v1688_v63, %v1687_v29 }
 0x5ab   : > { %v1336_v1 = vadd.f32 %v1689_v0, %v1649_v39  ;;  %v1690_v2 = vpop.f32.mrb[6].mxu0 }
 0x5ac   : > { %v1691_v3 = vpop.f32.mrb[7].mxu0 }
 0x5ad   : > { %v1344_v4 = vmul.f32 10.0, %v1336_v1  ;;  %v1692_v5 = vadd.f32 %v1691_v3, %v1690_v2 }
 0x5af   : > { %v1346_v7 = vadd.f32 50.0, %v1344_v4  ;;  %v1341_v8 = vadd.f32 %v1692_v5, %v1649_v39 }
 0x5b1   : > { %1349 = vst.msk [vmem:[%s360_s13] sm:$0xff] %vm1348_vm1, %v1346_v7  ;;  %v1345_v61 = vmul.f32 10.0, %v1341_v8 }
 0x5b3   : > { %v1347_v9 = vadd.f32 50.0, %v1345_v61 }
 0x5b5   : > { %1350 = vst.msk [vmem:[%s360_s13 + $0x8] sm:$0xff] %vm1348_vm1, %v1347_v9 }
 0x5b6 PF: > { %s18_s27 = sadd.s32 1, %s2012_s27  }
 0x5b7   : > { %p15_p4 = scmp.ge.s32.totalorder %s18_s27, 4  }
 0x5b9   :  { %17 = sbr.rel (!%p15_p4) target bundleno = 1 (0x1), region = 97 }

</bundles_post_ra>
